<compile_context>
chip_gen: v6e
topology: v6e:2x2x1
jax: 0.10.0
libtpu: 0.0.40
codegen_flags: <defaults>
</compile_context>

<pallas_src>
import functools

import jax
import jax.numpy as jnp
from jax.experimental import pallas as pl
from jax.experimental.pallas import tpu as pltpu

K = 5        # Conv1d kernel size (all three stages)
PAD = 2      # 'same' padding
HALO = 8     # sublane-aligned zero halo at the front of the stage-input scratches
LANES = 128  # channel dim padded to one full lane group


def _round_up(x, m):
    return (x + m - 1) // m * m


def _pick_block_b(B, max_bb=8):
    """Largest batch block <= max_bb that divides B while keeping >= 2 grid steps."""
    best = 1
    for bb in range(1, min(B, max_bb) + 1):
        if B % bb == 0 and B // bb >= 2:
            best = bb
    return best


def fused_audio_conv_kernel(x1_ref, w1_ref, b1_ref, w2_ref, b2_ref, w3_ref, b3_ref,
                            wl1_ref, bl1_ref, wl2_ref, bl2_ref,
                            o_ref,
                            c1_ref, x2_ref, c2_ref, x3_ref, c3_ref,
                            *, T, BB, SEG2, SEG3):
    T1 = T // 2          # length after pool-2
    T2 = T1 // 2         # length after second pool-2
    T3 = T2 // 4         # length after pool-4
    M2 = (BB - 1) * SEG2 + T1   # conv-2 output rows actually consumed
    M3 = (BB - 1) * SEG3 + T2   # conv-3 output rows actually consumed

    # Zero only the halo/gap rows; interior rows are overwritten every step.
    # Unconditional so every TensorCore's private scratch is initialised under
    # megacore splitting of the "parallel" grid axis.
    x2_ref[pl.ds(0, HALO), :] = jnp.zeros((HALO, LANES), jnp.float32)
    x3_ref[pl.ds(0, HALO), :] = jnp.zeros((HALO, LANES), jnp.float32)
    for s in range(BB):
        x2_ref[pl.ds(HALO + s * SEG2 + T1, SEG2 - T1), :] = jnp.zeros((SEG2 - T1, LANES), jnp.float32)
        x3_ref[pl.ds(HALO + s * SEG3 + T2, SEG3 - T2), :] = jnp.zeros((SEG3 - T2, LANES), jnp.float32)

    # ---- Stage 1: Conv1d(Ca->64,k5,p2)+ReLU on the stacked (BB*T) rows (taps
    # pre-folded into the K*Ca contraction by the wrapper), per-sample MaxPool(2).
    c1 = jnp.dot(x1_ref[...], w1_ref[...], preferred_element_type=jnp.float32)
    c1_ref[...] = jnp.maximum(c1 + b1_ref[...], 0.0)       # (BB*T, 128); lanes >=64 are 0
    for s in range(BB):
        p1 = jnp.maximum(c1_ref[pl.ds(s * T, T1, stride=2), :],
                         c1_ref[pl.ds(s * T + 1, T1, stride=2), :])
        x2_ref[pl.ds(HALO + s * SEG2, T1), :] = p1          # interiors; gap rows stay zero

    # ---- Stage 2: Conv1d(64->96,k5,p2)+ReLU as K accumulating tap matmuls on
    # +-2 shifted windows of the stacked stage-2 input, then per-sample MaxPool(2).
    acc2 = jnp.dot(x2_ref[pl.ds(HALO - PAD, M2), :].astype(jnp.bfloat16), w2_ref[0],
                   preferred_element_type=jnp.float32)
    for k in range(1, K):
        acc2 = acc2 + jnp.dot(x2_ref[pl.ds(HALO - PAD + k, M2), :].astype(jnp.bfloat16),
                              w2_ref[k], preferred_element_type=jnp.float32)
    c2_ref[...] = jnp.maximum(acc2 + b2_ref[...], 0.0)      # (M2, 128); lanes >=96 are 0
    for s in range(BB):
        p2 = jnp.maximum(c2_ref[pl.ds(s * SEG2, T2, stride=2), :],
                         c2_ref[pl.ds(s * SEG2 + 1, T2, stride=2), :])
        x3_ref[pl.ds(HALO + s * SEG3, T2), :] = p2

    # ---- Stage 3: Conv1d(96->128,k5,p2)+ReLU, per-sample MaxPool(4) + mean(T).
    acc3 = jnp.dot(x3_ref[pl.ds(HALO - PAD, M3), :].astype(jnp.bfloat16), w3_ref[0],
                   preferred_element_type=jnp.float32)
    for k in range(1, K):
        acc3 = acc3 + jnp.dot(x3_ref[pl.ds(HALO - PAD + k, M3), :].astype(jnp.bfloat16),
                              w3_ref[k], preferred_element_type=jnp.float32)
    c3_ref[...] = jnp.maximum(acc3 + b3_ref[...], 0.0)      # (M3, 128)

    feats = []
    for s in range(BB):
        pooled = c3_ref[pl.ds(s * SEG3, T3, stride=4), :]
        for q in range(1, 4):
            pooled = jnp.maximum(pooled, c3_ref[pl.ds(s * SEG3 + q, T3, stride=4), :])
        feats.append(jnp.mean(pooled, axis=0, keepdims=True))
    feats = jnp.concatenate(feats, axis=0) if BB > 1 else feats[0]   # (BB, 128)

    # ---- Head: Linear(128,64)+ReLU -> Linear(64,4) -> log_softmax
    h = jnp.dot(feats, wl1_ref[...], preferred_element_type=jnp.float32) + bl1_ref[...]
    h = jnp.maximum(h, 0.0)                                          # (BB, 64)
    logits = jnp.dot(h, wl2_ref[...], preferred_element_type=jnp.float32) + bl2_ref[...]
    z = logits - jnp.max(logits, axis=1, keepdims=True)
    lse = jnp.log(jnp.sum(jnp.exp(z), axis=1, keepdims=True))
    o_ref[0] = z - lse                                               # (BB, 4)


def audio_conv_forward(audio, params, block_b=None):
    """audio: (B, T, audio_size). params: output of prepare_params. Returns (B, 4) log-probs."""
    x = audio.astype(jnp.float32)
    B, T, Ca = x.shape
    if T < 16:
        raise ValueError("audio_conv needs at least 16 time steps (pool 2*2*4)")
    BB = _pick_block_b(B) if block_b is None else block_b
    if B % BB != 0:
        raise ValueError("block_b must divide the batch size")
    nblk = B // BB
    T1, T2 = T // 2, (T // 2) // 2
    # Per-sample segment strides in the stacked stage-2/3 input scratches; the
    # >= 2*PAD zero rows between segments realise each sample's conv padding.
    SEG2 = _round_up(T1 + 2 * PAD, 8)
    SEG3 = _round_up(T2 + 2 * PAD, 8)
    M2 = (BB - 1) * SEG2 + T1
    M3 = (BB - 1) * SEG3 + T2

    # Layer-1 im2col in the wrapper: folds the K taps (and halo padding) of the tiny
    # Cin=audio_size input into a (B*T, K*Ca) bf16 slab -> one dense MXU contraction.
    xp = jnp.pad(x, ((0, 0), (PAD, PAD), (0, 0)))
    x1col = jnp.concatenate([xp[:, k:k + T, :] for k in range(K)], axis=-1)
    x1col = x1col.reshape(B * T, K * Ca).astype(jnp.bfloat16)
    KCa = K * Ca

    kernel = functools.partial(fused_audio_conv_kernel, T=T, BB=BB, SEG2=SEG2, SEG3=SEG3)
    full2 = lambda g: (0, 0)
    full3 = lambda g: (0, 0, 0)
    out = pl.pallas_call(
        kernel,
        out_shape=jax.ShapeDtypeStruct((nblk, BB, 4), jnp.float32),
        grid=(nblk,),
        in_specs=[
            pl.BlockSpec((BB * T, KCa), lambda g: (g, 0)),   # layer-1 im2col slab (bf16)
            pl.BlockSpec((KCa, LANES), full2),               # wc1 (K*Ca, 128) bf16
            pl.BlockSpec((1, LANES), full2),                 # bc1
            pl.BlockSpec((K, LANES, LANES), full3),          # wc2 taps (5,128,128) bf16
            pl.BlockSpec((1, LANES), full2),                 # bc2
            pl.BlockSpec((K, LANES, LANES), full3),          # wc3 taps (5,128,128) bf16
            pl.BlockSpec((1, LANES), full2),                 # bc3
            pl.BlockSpec((LANES, 64), full2),                # wl1
            pl.BlockSpec((1, 64), full2),                    # bl1
            pl.BlockSpec((64, 4), full2),                    # wl2
            pl.BlockSpec((1, 4), full2),                     # bl2
        ],
        out_specs=pl.BlockSpec((1, BB, 4), lambda g: (g, 0, 0)),
        scratch_shapes=[
            pltpu.VMEM((BB * T, LANES), jnp.float32),             # conv-1 output (pre-pool)
            pltpu.VMEM((HALO + BB * SEG2, LANES), jnp.float32),   # stage-2 stacked input
            pltpu.VMEM((M2, LANES), jnp.float32),                 # conv-2 output (pre-pool)
            pltpu.VMEM((HALO + BB * SEG3, LANES), jnp.float32),   # stage-3 stacked input
            pltpu.VMEM((M3, LANES), jnp.float32),                 # conv-3 output (pre-pool)
        ],
        compiler_params=pltpu.CompilerParams(
            dimension_semantics=("parallel",)),
    )(x1col, params["wc1"], params["bc1"], params["wc2"], params["bc2"],
      params["wc3"], params["bc3"], params["wl1"], params["bl1"],
      params["wl2"], params["bl2"])
    return out.reshape(B, 4)


def make_torch_style_params(key, audio_size):
    """Synthetic parameters in PyTorch layout: Conv1d (Cout,Cin,K), Linear (out,in)."""
    ks = jax.random.split(key, 5)
    s = 0.1
    return {
        "conv1_w": s * jax.random.normal(ks[0], (64, audio_size, K), jnp.float32),
        "conv1_b": jnp.full((64,), 0.01, jnp.float32),
        "conv2_w": s * jax.random.normal(ks[1], (96, 64, K), jnp.float32),
        "conv2_b": jnp.full((96,), 0.01, jnp.float32),
        "conv3_w": s * jax.random.normal(ks[2], (128, 96, K), jnp.float32),
        "conv3_b": jnp.full((128,), 0.01, jnp.float32),
        "fc1_w": s * jax.random.normal(ks[3], (64, 128), jnp.float32),
        "fc1_b": jnp.full((64,), 0.01, jnp.float32),
        "fc2_w": s * jax.random.normal(ks[4], (4, 64), jnp.float32),
        "fc2_b": jnp.full((4,), 0.01, jnp.float32),
    }


def prepare_params(pt, audio_size):
    """PyTorch-layout params -> kernel layout (folded/tap weights, 128-lane padded, bf16)."""
    def conv1_col(w):                         # (64, Ca, K) -> (K*Ca, 128); row = k*Ca + ci
        cout, cin, k = w.shape
        w = jnp.transpose(w, (2, 1, 0))       # (K, Ca, Cout)
        w = jnp.pad(w, ((0, 0), (0, 0), (0, LANES - cout)))
        return w.reshape(k * cin, LANES).astype(jnp.bfloat16)

    def conv_taps(w):                         # (Cout, Cin, K) -> (K, 128, 128) per-tap matrices
        cout, cin, k = w.shape
        w = jnp.transpose(w, (2, 1, 0))       # (K, Cin, Cout)
        w = jnp.pad(w, ((0, 0), (0, LANES - cin), (0, LANES - cout)))
        return w.astype(jnp.bfloat16)

    def pad_bias(b):
        return jnp.pad(b, (0, LANES - b.shape[0])).reshape(1, LANES).astype(jnp.float32)

    return {
        "wc1": conv1_col(pt["conv1_w"]),
        "bc1": pad_bias(pt["conv1_b"]),
        "wc2": conv_taps(pt["conv2_w"]),
        "bc2": pad_bias(pt["conv2_b"]),
        "wc3": conv_taps(pt["conv3_w"]),
        "bc3": pad_bias(pt["conv3_b"]),
        "wl1": jnp.transpose(pt["fc1_w"]).astype(jnp.float32),   # (128, 64)
        "bl1": pt["fc1_b"].reshape(1, 64).astype(jnp.float32),
        "wl2": jnp.transpose(pt["fc2_w"]).astype(jnp.float32),   # (64, 4)
        "bl2": pt["fc2_b"].reshape(1, 4).astype(jnp.float32),
    }


def reference_forward(audio, pt):
    """Pure-JAX f32 reference mirroring the PyTorch module (eval mode)."""
    x = jnp.transpose(audio.astype(jnp.float32), (0, 2, 1))      # (B, C, T)

    def conv1d(x, w, b):
        y = jax.lax.conv_general_dilated(x, w, window_strides=(1,), padding=((PAD, PAD),),
                                         dimension_numbers=("NCH", "OIH", "NCH"))
        return y + b[None, :, None]

    def maxpool(x, k):
        n = x.shape[-1] // k
        return jnp.max(x[..., :n * k].reshape(x.shape[0], x.shape[1], n, k), axis=-1)

    x = maxpool(jnp.maximum(conv1d(x, pt["conv1_w"], pt["conv1_b"]), 0.0), 2)
    x = maxpool(jnp.maximum(conv1d(x, pt["conv2_w"], pt["conv2_b"]), 0.0), 2)
    x = maxpool(jnp.maximum(conv1d(x, pt["conv3_w"], pt["conv3_b"]), 0.0), 4)
    x = jnp.mean(x, axis=-1)                                     # (B, 128)
    h = jnp.maximum(x @ pt["fc1_w"].T + pt["fc1_b"], 0.0)
    logits = h @ pt["fc2_w"].T + pt["fc2_b"]
    return jax.nn.log_softmax(logits, axis=-1)


if __name__ == "__main__":
    key = jax.random.PRNGKey(0)
    k_audio, k_params = jax.random.split(key)

    B, T, audio_size = 4, 32, 4      # BB=2 -> grid=(2,): exercises the stacked-batch path
    audio = jax.random.normal(k_audio, (B, T, audio_size), jnp.float32)
    pt_params = make_torch_style_params(k_params, audio_size)
    params = prepare_params(pt_params, audio_size)

    out = audio_conv_forward(audio, params)
    out = jax.block_until_ready(out)

    assert out.shape == (B, 4)
    assert bool(jnp.all(jnp.isfinite(out)))
    row_sums = jnp.sum(jnp.exp(out), axis=1)
    assert bool(jnp.all(jnp.abs(row_sums - 1.0) < 1e-3))

    # Compare against the pure-JAX f32 reference (bf16 matmul inputs -> loose tol).
    ref = reference_forward(audio, pt_params)
    max_err = float(jnp.max(jnp.abs(out - ref)))
    assert max_err < 5e-2, f"max |kernel - reference| = {max_err}"
    print("KERNEL_OK")
</pallas_src>

<mosaic_0001>
module attributes {stable_mosaic.version = 11 : i64} {
  func.func @fused_audio_conv_kernel(%arg0: i32, %arg1: memref<64x20xbf16, #tpu.memory_space<vmem>>, %arg2: memref<20x128xbf16, #tpu.memory_space<vmem>>, %arg3: memref<1x128xf32, #tpu.memory_space<vmem>>, %arg4: memref<5x128x128xbf16, #tpu.memory_space<vmem>>, %arg5: memref<1x128xf32, #tpu.memory_space<vmem>>, %arg6: memref<5x128x128xbf16, #tpu.memory_space<vmem>>, %arg7: memref<1x128xf32, #tpu.memory_space<vmem>>, %arg8: memref<128x64xf32, #tpu.memory_space<vmem>>, %arg9: memref<1x64xf32, #tpu.memory_space<vmem>>, %arg10: memref<64x4xf32, #tpu.memory_space<vmem>>, %arg11: memref<1x4xf32, #tpu.memory_space<vmem>>, %arg12: memref<1x2x4xf32, #tpu.memory_space<vmem>>, %arg13: memref<64x128xf32, #tpu.memory_space<vmem>>, %arg14: memref<56x128xf32, #tpu.memory_space<vmem>>, %arg15: memref<40x128xf32, #tpu.memory_space<vmem>>, %arg16: memref<40x128xf32, #tpu.memory_space<vmem>>, %arg17: memref<24x128xf32, #tpu.memory_space<vmem>>) attributes {dimension_semantics = [#tpu.dimension_semantics<parallel>], iteration_bounds = array<i64: 2>, scalar_prefetch = 0 : i64, scratch_operands = 5 : i64, tpu.core_type = #tpu.core_type<tc>, window_params = [{transform_indices = @transform_0, window_bounds = array<i64: 64, 20>}, {pipeline_mode = #tpu.pipeline_mode<synchronous>, transform_indices = @transform_1, window_bounds = array<i64: 20, 128>}, {pipeline_mode = #tpu.pipeline_mode<synchronous>, transform_indices = @transform_2, window_bounds = array<i64: 1, 128>}, {pipeline_mode = #tpu.pipeline_mode<synchronous>, transform_indices = @transform_3, window_bounds = array<i64: 5, 128, 128>}, {pipeline_mode = #tpu.pipeline_mode<synchronous>, transform_indices = @transform_4, window_bounds = array<i64: 1, 128>}, {pipeline_mode = #tpu.pipeline_mode<synchronous>, transform_indices = @transform_5, window_bounds = array<i64: 5, 128, 128>}, {pipeline_mode = #tpu.pipeline_mode<synchronous>, transform_indices = @transform_6, window_bounds = array<i64: 1, 128>}, {pipeline_mode = #tpu.pipeline_mode<synchronous>, transform_indices = @transform_7, window_bounds = array<i64: 128, 64>}, {pipeline_mode = #tpu.pipeline_mode<synchronous>, transform_indices = @transform_8, window_bounds = array<i64: 1, 64>}, {pipeline_mode = #tpu.pipeline_mode<synchronous>, transform_indices = @transform_9, window_bounds = array<i64: 64, 4>}, {pipeline_mode = #tpu.pipeline_mode<synchronous>, transform_indices = @transform_10, window_bounds = array<i64: 1, 4>}, {transform_indices = @transform_11, window_bounds = array<i64: 1, 2, 4>}]} {
    %cst = arith.constant 0.000000e+00 : f32
    %0 = vector.broadcast %cst : f32 to vector<8x128xf32>
    %c0 = arith.constant 0 : index
    %c0_0 = arith.constant 0 : index
    %1 = vector.load %arg14[%c0, %c0_0] : memref<56x128xf32, #tpu.memory_space<vmem>>, vector<8x128xf32>
    tpu.vector_store %arg14[%c0, %c0_0], %0 {strides = array<i32>} : memref<56x128xf32, #tpu.memory_space<vmem>>, vector<8x128xf32>,
    %cst_1 = arith.constant 0.000000e+00 : f32
    %2 = vector.broadcast %cst_1 : f32 to vector<8x128xf32>
    %c0_2 = arith.constant 0 : index
    %c0_3 = arith.constant 0 : index
    %3 = vector.load %arg16[%c0_2, %c0_3] : memref<40x128xf32, #tpu.memory_space<vmem>>, vector<8x128xf32>
    tpu.vector_store %arg16[%c0_2, %c0_3], %2 {strides = array<i32>} : memref<40x128xf32, #tpu.memory_space<vmem>>, vector<8x128xf32>,
    %cst_4 = arith.constant 0.000000e+00 : f32
    %4 = vector.broadcast %cst_4 : f32 to vector<8x128xf32>
    %c24 = arith.constant 24 : index
    %c0_5 = arith.constant 0 : index
    %5 = vector.load %arg14[%c24, %c0_5] : memref<56x128xf32, #tpu.memory_space<vmem>>, vector<8x128xf32>
    tpu.vector_store %arg14[%c24, %c0_5], %4 {strides = array<i32>} : memref<56x128xf32, #tpu.memory_space<vmem>>, vector<8x128xf32>,
    %cst_6 = arith.constant 0.000000e+00 : f32
    %6 = vector.broadcast %cst_6 : f32 to vector<8x128xf32>
    %c16 = arith.constant 16 : index
    %c0_7 = arith.constant 0 : index
    %7 = vector.load %arg16[%c16, %c0_7] : memref<40x128xf32, #tpu.memory_space<vmem>>, vector<8x128xf32>
    tpu.vector_store %arg16[%c16, %c0_7], %6 {strides = array<i32>} : memref<40x128xf32, #tpu.memory_space<vmem>>, vector<8x128xf32>,
    %cst_8 = arith.constant 0.000000e+00 : f32
    %8 = vector.broadcast %cst_8 : f32 to vector<8x128xf32>
    %c48 = arith.constant 48 : index
    %c0_9 = arith.constant 0 : index
    %9 = vector.load %arg14[%c48, %c0_9] : memref<56x128xf32, #tpu.memory_space<vmem>>, vector<8x128xf32>
    tpu.vector_store %arg14[%c48, %c0_9], %8 {strides = array<i32>} : memref<56x128xf32, #tpu.memory_space<vmem>>, vector<8x128xf32>,
    %cst_10 = arith.constant 0.000000e+00 : f32
    %10 = vector.broadcast %cst_10 : f32 to vector<8x128xf32>
    %c32 = arith.constant 32 : index
    %c0_11 = arith.constant 0 : index
    %11 = vector.load %arg16[%c32, %c0_11] : memref<40x128xf32, #tpu.memory_space<vmem>>, vector<8x128xf32>
    tpu.vector_store %arg16[%c32, %c0_11], %10 {strides = array<i32>} : memref<40x128xf32, #tpu.memory_space<vmem>>, vector<8x128xf32>,
    %c0_12 = arith.constant 0 : index
    %c0_13 = arith.constant 0 : index
    %12 = vector.load %arg1[%c0_12, %c0_13] : memref<64x20xbf16, #tpu.memory_space<vmem>>, vector<64x20xbf16>
    %c0_14 = arith.constant 0 : index
    %c0_15 = arith.constant 0 : index
    %13 = vector.load %arg2[%c0_14, %c0_15] : memref<20x128xbf16, #tpu.memory_space<vmem>>, vector<20x128xbf16>
    %cst_16 = arith.constant dense<0.000000e+00> : vector<64x128xf32>
    %14 = tpu.matmul %12, %13, %cst_16 {dimension_numbers = #tpu.dot_dimension_numbers<[1], [0], [0], [1], [0, 0, 1, 1], [], []>} : vector<64x20xbf16>, vector<20x128xbf16>, vector<64x128xf32> -> vector<64x128xf32>
    %c0_17 = arith.constant 0 : index
    %c0_18 = arith.constant 0 : index
    %15 = vector.load %arg3[%c0_17, %c0_18] : memref<1x128xf32, #tpu.memory_space<vmem>>, vector<1x128xf32>
    %16 = vector.broadcast %15 : vector<1x128xf32> to vector<64x128xf32>
    %17 = arith.addf %14, %16 : vector<64x128xf32>
    %cst_19 = arith.constant 0.000000e+00 : f32
    %18 = vector.broadcast %cst_19 : f32 to vector<64x128xf32>
    %19 = arith.maximumf %17, %18 : vector<64x128xf32>
    %c0_20 = arith.constant 0 : index
    %c0_21 = arith.constant 0 : index
    %20 = vector.load %arg13[%c0_20, %c0_21] : memref<64x128xf32, #tpu.memory_space<vmem>>, vector<64x128xf32>
    tpu.vector_store %arg13[%c0_20, %c0_21], %19 {strides = array<i32>} : memref<64x128xf32, #tpu.memory_space<vmem>>, vector<64x128xf32>,
    %c0_22 = arith.constant 0 : index
    %c0_23 = arith.constant 0 : index
    %21 = tpu.strided_load %arg13[%c0_22, %c0_23] {strides = array<i32: 2, 1>} : memref<64x128xf32, #tpu.memory_space<vmem>>, vector<16x128xf32>
    %c1 = arith.constant 1 : index
    %c0_24 = arith.constant 0 : index
    %22 = tpu.strided_load %arg13[%c1, %c0_24] {strides = array<i32: 2, 1>} : memref<64x128xf32, #tpu.memory_space<vmem>>, vector<16x128xf32>
    %23 = arith.maximumf %21, %22 : vector<16x128xf32>
    %c8 = arith.constant 8 : index
    %c0_25 = arith.constant 0 : index
    %24 = vector.load %arg14[%c8, %c0_25] : memref<56x128xf32, #tpu.memory_space<vmem>>, vector<16x128xf32>
    tpu.vector_store %arg14[%c8, %c0_25], %23 {strides = array<i32>} : memref<56x128xf32, #tpu.memory_space<vmem>>, vector<16x128xf32>,
    %c32_26 = arith.constant 32 : index
    %c0_27 = arith.constant 0 : index
    %25 = tpu.strided_load %arg13[%c32_26, %c0_27] {strides = array<i32: 2, 1>} : memref<64x128xf32, #tpu.memory_space<vmem>>, vector<16x128xf32>
    %c33 = arith.constant 33 : index
    %c0_28 = arith.constant 0 : index
    %26 = tpu.strided_load %arg13[%c33, %c0_28] {strides = array<i32: 2, 1>} : memref<64x128xf32, #tpu.memory_space<vmem>>, vector<16x128xf32>
    %27 = arith.maximumf %25, %26 : vector<16x128xf32>
    %c32_29 = arith.constant 32 : index
    %c0_30 = arith.constant 0 : index
    %28 = vector.load %arg14[%c32_29, %c0_30] : memref<56x128xf32, #tpu.memory_space<vmem>>, vector<16x128xf32>
    tpu.vector_store %arg14[%c32_29, %c0_30], %27 {strides = array<i32>} : memref<56x128xf32, #tpu.memory_space<vmem>>, vector<16x128xf32>,
    %c6 = arith.constant 6 : index
    %c0_31 = arith.constant 0 : index
    %29 = vector.load %arg14[%c6, %c0_31] : memref<56x128xf32, #tpu.memory_space<vmem>>, vector<40x128xf32>
    %30 = arith.truncf %29 : vector<40x128xf32> to vector<40x128xbf16>
    %c0_32 = arith.constant 0 : index
    %c0_33 = arith.constant 0 : index
    %c0_34 = arith.constant 0 : index
    %31 = vector.load %arg4[%c0_32, %c0_33, %c0_34] : memref<5x128x128xbf16, #tpu.memory_space<vmem>>, vector<1x128x128xbf16>
    %32 = vector.shape_cast %31 : vector<1x128x128xbf16> to vector<128x128xbf16>
    %cst_35 = arith.constant dense<0.000000e+00> : vector<40x128xf32>
    %33 = tpu.matmul %30, %32, %cst_35 {dimension_numbers = #tpu.dot_dimension_numbers<[1], [0], [0], [1], [0, 0, 1, 1], [], []>} : vector<40x128xbf16>, vector<128x128xbf16>, vector<40x128xf32> -> vector<40x128xf32>
    %c7 = arith.constant 7 : index
    %c0_36 = arith.constant 0 : index
    %34 = vector.load %arg14[%c7, %c0_36] : memref<56x128xf32, #tpu.memory_space<vmem>>, vector<40x128xf32>
    %35 = arith.truncf %34 : vector<40x128xf32> to vector<40x128xbf16>
    %c1_37 = arith.constant 1 : index
    %c0_38 = arith.constant 0 : index
    %c0_39 = arith.constant 0 : index
    %36 = vector.load %arg4[%c1_37, %c0_38, %c0_39] : memref<5x128x128xbf16, #tpu.memory_space<vmem>>, vector<1x128x128xbf16>
    %37 = vector.shape_cast %36 : vector<1x128x128xbf16> to vector<128x128xbf16>
    %cst_40 = arith.constant dense<0.000000e+00> : vector<40x128xf32>
    %38 = tpu.matmul %35, %37, %cst_40 {dimension_numbers = #tpu.dot_dimension_numbers<[1], [0], [0], [1], [0, 0, 1, 1], [], []>} : vector<40x128xbf16>, vector<128x128xbf16>, vector<40x128xf32> -> vector<40x128xf32>
    %39 = arith.addf %33, %38 : vector<40x128xf32>
    %c8_41 = arith.constant 8 : index
    %c0_42 = arith.constant 0 : index
    %40 = vector.load %arg14[%c8_41, %c0_42] : memref<56x128xf32, #tpu.memory_space<vmem>>, vector<40x128xf32>
    %41 = arith.truncf %40 : vector<40x128xf32> to vector<40x128xbf16>
    %c2 = arith.constant 2 : index
    %c0_43 = arith.constant 0 : index
    %c0_44 = arith.constant 0 : index
    %42 = vector.load %arg4[%c2, %c0_43, %c0_44] : memref<5x128x128xbf16, #tpu.memory_space<vmem>>, vector<1x128x128xbf16>
    %43 = vector.shape_cast %42 : vector<1x128x128xbf16> to vector<128x128xbf16>
    %cst_45 = arith.constant dense<0.000000e+00> : vector<40x128xf32>
    %44 = tpu.matmul %41, %43, %cst_45 {dimension_numbers = #tpu.dot_dimension_numbers<[1], [0], [0], [1], [0, 0, 1, 1], [], []>} : vector<40x128xbf16>, vector<128x128xbf16>, vector<40x128xf32> -> vector<40x128xf32>
    %45 = arith.addf %39, %44 : vector<40x128xf32>
    %c9 = arith.constant 9 : index
    %c0_46 = arith.constant 0 : index
    %46 = vector.load %arg14[%c9, %c0_46] : memref<56x128xf32, #tpu.memory_space<vmem>>, vector<40x128xf32>
    %47 = arith.truncf %46 : vector<40x128xf32> to vector<40x128xbf16>
    %c3 = arith.constant 3 : index
    %c0_47 = arith.constant 0 : index
    %c0_48 = arith.constant 0 : index
    %48 = vector.load %arg4[%c3, %c0_47, %c0_48] : memref<5x128x128xbf16, #tpu.memory_space<vmem>>, vector<1x128x128xbf16>
    %49 = vector.shape_cast %48 : vector<1x128x128xbf16> to vector<128x128xbf16>
    %cst_49 = arith.constant dense<0.000000e+00> : vector<40x128xf32>
    %50 = tpu.matmul %47, %49, %cst_49 {dimension_numbers = #tpu.dot_dimension_numbers<[1], [0], [0], [1], [0, 0, 1, 1], [], []>} : vector<40x128xbf16>, vector<128x128xbf16>, vector<40x128xf32> -> vector<40x128xf32>
    %51 = arith.addf %45, %50 : vector<40x128xf32>
    %c10 = arith.constant 10 : index
    %c0_50 = arith.constant 0 : index
    %52 = vector.load %arg14[%c10, %c0_50] : memref<56x128xf32, #tpu.memory_space<vmem>>, vector<40x128xf32>
    %53 = arith.truncf %52 : vector<40x128xf32> to vector<40x128xbf16>
    %c4 = arith.constant 4 : index
    %c0_51 = arith.constant 0 : index
    %c0_52 = arith.constant 0 : index
    %54 = vector.load %arg4[%c4, %c0_51, %c0_52] : memref<5x128x128xbf16, #tpu.memory_space<vmem>>, vector<1x128x128xbf16>
    %55 = vector.shape_cast %54 : vector<1x128x128xbf16> to vector<128x128xbf16>
    %cst_53 = arith.constant dense<0.000000e+00> : vector<40x128xf32>
    %56 = tpu.matmul %53, %55, %cst_53 {dimension_numbers = #tpu.dot_dimension_numbers<[1], [0], [0], [1], [0, 0, 1, 1], [], []>} : vector<40x128xbf16>, vector<128x128xbf16>, vector<40x128xf32> -> vector<40x128xf32>
    %57 = arith.addf %51, %56 : vector<40x128xf32>
    %c0_54 = arith.constant 0 : index
    %c0_55 = arith.constant 0 : index
    %58 = vector.load %arg5[%c0_54, %c0_55] : memref<1x128xf32, #tpu.memory_space<vmem>>, vector<1x128xf32>
    %59 = vector.broadcast %58 : vector<1x128xf32> to vector<40x128xf32>
    %60 = arith.addf %57, %59 : vector<40x128xf32>
    %cst_56 = arith.constant 0.000000e+00 : f32
    %61 = vector.broadcast %cst_56 : f32 to vector<40x128xf32>
    %62 = arith.maximumf %60, %61 : vector<40x128xf32>
    %c0_57 = arith.constant 0 : index
    %c0_58 = arith.constant 0 : index
    %63 = vector.load %arg15[%c0_57, %c0_58] : memref<40x128xf32, #tpu.memory_space<vmem>>, vector<40x128xf32>
    tpu.vector_store %arg15[%c0_57, %c0_58], %62 {strides = array<i32>} : memref<40x128xf32, #tpu.memory_space<vmem>>, vector<40x128xf32>,
    %c0_59 = arith.constant 0 : index
    %c0_60 = arith.constant 0 : index
    %64 = tpu.strided_load %arg15[%c0_59, %c0_60] {strides = array<i32: 2, 1>} : memref<40x128xf32, #tpu.memory_space<vmem>>, vector<8x128xf32>
    %c1_61 = arith.constant 1 : index
    %c0_62 = arith.constant 0 : index
    %65 = tpu.strided_load %arg15[%c1_61, %c0_62] {strides = array<i32: 2, 1>} : memref<40x128xf32, #tpu.memory_space<vmem>>, vector<8x128xf32>
    %66 = arith.maximumf %64, %65 : vector<8x128xf32>
    %c8_63 = arith.constant 8 : index
    %c0_64 = arith.constant 0 : index
    %67 = vector.load %arg16[%c8_63, %c0_64] : memref<40x128xf32, #tpu.memory_space<vmem>>, vector<8x128xf32>
    tpu.vector_store %arg16[%c8_63, %c0_64], %66 {strides = array<i32>} : memref<40x128xf32, #tpu.memory_space<vmem>>, vector<8x128xf32>,
    %c24_65 = arith.constant 24 : index
    %c0_66 = arith.constant 0 : index
    %68 = tpu.strided_load %arg15[%c24_65, %c0_66] {strides = array<i32: 2, 1>} : memref<40x128xf32, #tpu.memory_space<vmem>>, vector<8x128xf32>
    %c25 = arith.constant 25 : index
    %c0_67 = arith.constant 0 : index
    %69 = tpu.strided_load %arg15[%c25, %c0_67] {strides = array<i32: 2, 1>} : memref<40x128xf32, #tpu.memory_space<vmem>>, vector<8x128xf32>
    %70 = arith.maximumf %68, %69 : vector<8x128xf32>
    %c24_68 = arith.constant 24 : index
    %c0_69 = arith.constant 0 : index
    %71 = vector.load %arg16[%c24_68, %c0_69] : memref<40x128xf32, #tpu.memory_space<vmem>>, vector<8x128xf32>
    tpu.vector_store %arg16[%c24_68, %c0_69], %70 {strides = array<i32>} : memref<40x128xf32, #tpu.memory_space<vmem>>, vector<8x128xf32>,
    %c6_70 = arith.constant 6 : index
    %c0_71 = arith.constant 0 : index
    %72 = vector.load %arg16[%c6_70, %c0_71] : memref<40x128xf32, #tpu.memory_space<vmem>>, vector<24x128xf32>
    %73 = arith.truncf %72 : vector<24x128xf32> to vector<24x128xbf16>
    %c0_72 = arith.constant 0 : index
    %c0_73 = arith.constant 0 : index
    %c0_74 = arith.constant 0 : index
    %74 = vector.load %arg6[%c0_72, %c0_73, %c0_74] : memref<5x128x128xbf16, #tpu.memory_space<vmem>>, vector<1x128x128xbf16>
    %75 = vector.shape_cast %74 : vector<1x128x128xbf16> to vector<128x128xbf16>
    %cst_75 = arith.constant dense<0.000000e+00> : vector<24x128xf32>
    %76 = tpu.matmul %73, %75, %cst_75 {dimension_numbers = #tpu.dot_dimension_numbers<[1], [0], [0], [1], [0, 0, 1, 1], [], []>} : vector<24x128xbf16>, vector<128x128xbf16>, vector<24x128xf32> -> vector<24x128xf32>
    %c7_76 = arith.constant 7 : index
    %c0_77 = arith.constant 0 : index
    %77 = vector.load %arg16[%c7_76, %c0_77] : memref<40x128xf32, #tpu.memory_space<vmem>>, vector<24x128xf32>
    %78 = arith.truncf %77 : vector<24x128xf32> to vector<24x128xbf16>
    %c1_78 = arith.constant 1 : index
    %c0_79 = arith.constant 0 : index
    %c0_80 = arith.constant 0 : index
    %79 = vector.load %arg6[%c1_78, %c0_79, %c0_80] : memref<5x128x128xbf16, #tpu.memory_space<vmem>>, vector<1x128x128xbf16>
    %80 = vector.shape_cast %79 : vector<1x128x128xbf16> to vector<128x128xbf16>
    %cst_81 = arith.constant dense<0.000000e+00> : vector<24x128xf32>
    %81 = tpu.matmul %78, %80, %cst_81 {dimension_numbers = #tpu.dot_dimension_numbers<[1], [0], [0], [1], [0, 0, 1, 1], [], []>} : vector<24x128xbf16>, vector<128x128xbf16>, vector<24x128xf32> -> vector<24x128xf32>
    %82 = arith.addf %76, %81 : vector<24x128xf32>
    %c8_82 = arith.constant 8 : index
    %c0_83 = arith.constant 0 : index
    %83 = vector.load %arg16[%c8_82, %c0_83] : memref<40x128xf32, #tpu.memory_space<vmem>>, vector<24x128xf32>
    %84 = arith.truncf %83 : vector<24x128xf32> to vector<24x128xbf16>
    %c2_84 = arith.constant 2 : index
    %c0_85 = arith.constant 0 : index
    %c0_86 = arith.constant 0 : index
    %85 = vector.load %arg6[%c2_84, %c0_85, %c0_86] : memref<5x128x128xbf16, #tpu.memory_space<vmem>>, vector<1x128x128xbf16>
    %86 = vector.shape_cast %85 : vector<1x128x128xbf16> to vector<128x128xbf16>
    %cst_87 = arith.constant dense<0.000000e+00> : vector<24x128xf32>
    %87 = tpu.matmul %84, %86, %cst_87 {dimension_numbers = #tpu.dot_dimension_numbers<[1], [0], [0], [1], [0, 0, 1, 1], [], []>} : vector<24x128xbf16>, vector<128x128xbf16>, vector<24x128xf32> -> vector<24x128xf32>
    %88 = arith.addf %82, %87 : vector<24x128xf32>
    %c9_88 = arith.constant 9 : index
    %c0_89 = arith.constant 0 : index
    %89 = vector.load %arg16[%c9_88, %c0_89] : memref<40x128xf32, #tpu.memory_space<vmem>>, vector<24x128xf32>
    %90 = arith.truncf %89 : vector<24x128xf32> to vector<24x128xbf16>
    %c3_90 = arith.constant 3 : index
    %c0_91 = arith.constant 0 : index
    %c0_92 = arith.constant 0 : index
    %91 = vector.load %arg6[%c3_90, %c0_91, %c0_92] : memref<5x128x128xbf16, #tpu.memory_space<vmem>>, vector<1x128x128xbf16>
    %92 = vector.shape_cast %91 : vector<1x128x128xbf16> to vector<128x128xbf16>
    %cst_93 = arith.constant dense<0.000000e+00> : vector<24x128xf32>
    %93 = tpu.matmul %90, %92, %cst_93 {dimension_numbers = #tpu.dot_dimension_numbers<[1], [0], [0], [1], [0, 0, 1, 1], [], []>} : vector<24x128xbf16>, vector<128x128xbf16>, vector<24x128xf32> -> vector<24x128xf32>
    %94 = arith.addf %88, %93 : vector<24x128xf32>
    %c10_94 = arith.constant 10 : index
    %c0_95 = arith.constant 0 : index
    %95 = vector.load %arg16[%c10_94, %c0_95] : memref<40x128xf32, #tpu.memory_space<vmem>>, vector<24x128xf32>
    %96 = arith.truncf %95 : vector<24x128xf32> to vector<24x128xbf16>
    %c4_96 = arith.constant 4 : index
    %c0_97 = arith.constant 0 : index
    %c0_98 = arith.constant 0 : index
    %97 = vector.load %arg6[%c4_96, %c0_97, %c0_98] : memref<5x128x128xbf16, #tpu.memory_space<vmem>>, vector<1x128x128xbf16>
    %98 = vector.shape_cast %97 : vector<1x128x128xbf16> to vector<128x128xbf16>
    %cst_99 = arith.constant dense<0.000000e+00> : vector<24x128xf32>
    %99 = tpu.matmul %96, %98, %cst_99 {dimension_numbers = #tpu.dot_dimension_numbers<[1], [0], [0], [1], [0, 0, 1, 1], [], []>} : vector<24x128xbf16>, vector<128x128xbf16>, vector<24x128xf32> -> vector<24x128xf32>
    %100 = arith.addf %94, %99 : vector<24x128xf32>
    %c0_100 = arith.constant 0 : index
    %c0_101 = arith.constant 0 : index
    %101 = vector.load %arg7[%c0_100, %c0_101] : memref<1x128xf32, #tpu.memory_space<vmem>>, vector<1x128xf32>
    %102 = vector.broadcast %101 : vector<1x128xf32> to vector<24x128xf32>
    %103 = arith.addf %100, %102 : vector<24x128xf32>
    %cst_102 = arith.constant 0.000000e+00 : f32
    %104 = vector.broadcast %cst_102 : f32 to vector<24x128xf32>
    %105 = arith.maximumf %103, %104 : vector<24x128xf32>
    %c0_103 = arith.constant 0 : index
    %c0_104 = arith.constant 0 : index
    %106 = vector.load %arg17[%c0_103, %c0_104] : memref<24x128xf32, #tpu.memory_space<vmem>>, vector<24x128xf32>
    tpu.vector_store %arg17[%c0_103, %c0_104], %105 {strides = array<i32>} : memref<24x128xf32, #tpu.memory_space<vmem>>, vector<24x128xf32>,
    %c0_105 = arith.constant 0 : index
    %c0_106 = arith.constant 0 : index
    %107 = tpu.strided_load %arg17[%c0_105, %c0_106] {strides = array<i32: 4, 1>} : memref<24x128xf32, #tpu.memory_space<vmem>>, vector<2x128xf32>
    %c1_107 = arith.constant 1 : index
    %c0_108 = arith.constant 0 : index
    %108 = tpu.strided_load %arg17[%c1_107, %c0_108] {strides = array<i32: 4, 1>} : memref<24x128xf32, #tpu.memory_space<vmem>>, vector<2x128xf32>
    %109 = arith.maximumf %107, %108 : vector<2x128xf32>
    %c2_109 = arith.constant 2 : index
    %c0_110 = arith.constant 0 : index
    %110 = tpu.strided_load %arg17[%c2_109, %c0_110] {strides = array<i32: 4, 1>} : memref<24x128xf32, #tpu.memory_space<vmem>>, vector<2x128xf32>
    %111 = arith.maximumf %109, %110 : vector<2x128xf32>
    %c3_111 = arith.constant 3 : index
    %c0_112 = arith.constant 0 : index
    %112 = tpu.strided_load %arg17[%c3_111, %c0_112] {strides = array<i32: 4, 1>} : memref<24x128xf32, #tpu.memory_space<vmem>>, vector<2x128xf32>
    %113 = arith.maximumf %111, %112 : vector<2x128xf32>
    %cst_113 = arith.constant dense<0.000000e+00> : vector<128xf32>
    %114 = vector.multi_reduction <add>, %113, %cst_113 [0] : vector<2x128xf32> to vector<128xf32>
    %115 = vector.shape_cast %114 : vector<128xf32> to vector<1x128xf32>
    %cst_114 = arith.constant 2.000000e+00 : f32
    %116 = vector.broadcast %cst_114 : f32 to vector<1x128xf32>
    %117 = arith.divf %115, %116 : vector<1x128xf32>
    %c16_115 = arith.constant 16 : index
    %c0_116 = arith.constant 0 : index
    %118 = tpu.strided_load %arg17[%c16_115, %c0_116] {strides = array<i32: 4, 1>} : memref<24x128xf32, #tpu.memory_space<vmem>>, vector<2x128xf32>
    %c17 = arith.constant 17 : index
    %c0_117 = arith.constant 0 : index
    %119 = tpu.strided_load %arg17[%c17, %c0_117] {strides = array<i32: 4, 1>} : memref<24x128xf32, #tpu.memory_space<vmem>>, vector<2x128xf32>
    %120 = arith.maximumf %118, %119 : vector<2x128xf32>
    %c18 = arith.constant 18 : index
    %c0_118 = arith.constant 0 : index
    %121 = tpu.strided_load %arg17[%c18, %c0_118] {strides = array<i32: 4, 1>} : memref<24x128xf32, #tpu.memory_space<vmem>>, vector<2x128xf32>
    %122 = arith.maximumf %120, %121 : vector<2x128xf32>
    %c19 = arith.constant 19 : index
    %c0_119 = arith.constant 0 : index
    %123 = tpu.strided_load %arg17[%c19, %c0_119] {strides = array<i32: 4, 1>} : memref<24x128xf32, #tpu.memory_space<vmem>>, vector<2x128xf32>
    %124 = arith.maximumf %122, %123 : vector<2x128xf32>
    %cst_120 = arith.constant dense<0.000000e+00> : vector<128xf32>
    %125 = vector.multi_reduction <add>, %124, %cst_120 [0] : vector<2x128xf32> to vector<128xf32>
    %126 = vector.shape_cast %125 : vector<128xf32> to vector<1x128xf32>
    %cst_121 = arith.constant 2.000000e+00 : f32
    %127 = vector.broadcast %cst_121 : f32 to vector<1x128xf32>
    %128 = arith.divf %126, %127 : vector<1x128xf32>
    %129 = tpu.concatenate %117, %128 in 0 : vector<1x128xf32>, vector<1x128xf32> -> vector<2x128xf32>
    %c0_122 = arith.constant 0 : index
    %c0_123 = arith.constant 0 : index
    %130 = vector.load %arg8[%c0_122, %c0_123] : memref<128x64xf32, #tpu.memory_space<vmem>>, vector<128x64xf32>
    %cst_124 = arith.constant dense<0.000000e+00> : vector<2x64xf32>
    %131 = tpu.matmul %129, %130, %cst_124 {dimension_numbers = #tpu.dot_dimension_numbers<[1], [0], [0], [1], [0, 0, 1, 1], [], []>} : vector<2x128xf32>, vector<128x64xf32>, vector<2x64xf32> -> vector<2x64xf32>
    %c0_125 = arith.constant 0 : index
    %c0_126 = arith.constant 0 : index
    %132 = vector.load %arg9[%c0_125, %c0_126] : memref<1x64xf32, #tpu.memory_space<vmem>>, vector<1x64xf32>
    %133 = vector.broadcast %132 : vector<1x64xf32> to vector<2x64xf32>
    %134 = arith.addf %131, %133 : vector<2x64xf32>
    %cst_127 = arith.constant 0.000000e+00 : f32
    %135 = vector.broadcast %cst_127 : f32 to vector<2x64xf32>
    %136 = arith.maximumf %134, %135 : vector<2x64xf32>
    %c0_128 = arith.constant 0 : index
    %c0_129 = arith.constant 0 : index
    %137 = vector.load %arg10[%c0_128, %c0_129] : memref<64x4xf32, #tpu.memory_space<vmem>>, vector<64x4xf32>
    %cst_130 = arith.constant dense<0.000000e+00> : vector<2x4xf32>
    %138 = tpu.matmul %136, %137, %cst_130 {dimension_numbers = #tpu.dot_dimension_numbers<[1], [0], [0], [1], [0, 0, 1, 1], [], []>} : vector<2x64xf32>, vector<64x4xf32>, vector<2x4xf32> -> vector<2x4xf32>
    %c0_131 = arith.constant 0 : index
    %c0_132 = arith.constant 0 : index
    %139 = vector.load %arg11[%c0_131, %c0_132] : memref<1x4xf32, #tpu.memory_space<vmem>>, vector<1x4xf32>
    %140 = vector.broadcast %139 : vector<1x4xf32> to vector<2x4xf32>
    %141 = arith.addf %138, %140 : vector<2x4xf32>
    %cst_133 = arith.constant dense<0xFF800000> : vector<2xf32>
    %142 = vector.multi_reduction <maximumf>, %141, %cst_133 [1] : vector<2x4xf32> to vector<2xf32>
    %143 = vector.shape_cast %142 : vector<2xf32> to vector<2x1xf32>
    %144 = vector.broadcast %143 : vector<2x1xf32> to vector<2x4xf32>
    %145 = arith.subf %141, %144 : vector<2x4xf32>
    %146 = math.exp %145 : vector<2x4xf32>
    %cst_134 = arith.constant dense<0.000000e+00> : vector<2xf32>
    %147 = vector.multi_reduction <add>, %146, %cst_134 [1] : vector<2x4xf32> to vector<2xf32>
    %148 = vector.shape_cast %147 : vector<2xf32> to vector<2x1xf32>
    %149 = math.log %148 : vector<2x1xf32>
    %150 = vector.broadcast %149 : vector<2x1xf32> to vector<2x4xf32>
    %151 = arith.subf %145, %150 : vector<2x4xf32>
    %c0_135 = arith.constant 0 : index
    %c0_136 = arith.constant 0 : index
    %c0_137 = arith.constant 0 : index
    %152 = vector.load %arg12[%c0_135, %c0_136, %c0_137] : memref<1x2x4xf32, #tpu.memory_space<vmem>>, vector<1x2x4xf32>
    %153 = vector.shape_cast %152 : vector<1x2x4xf32> to vector<2x4xf32>
    %154 = vector.shape_cast %151 : vector<2x4xf32> to vector<1x2x4xf32>
    tpu.vector_store %arg12[%c0_135, %c0_136, %c0_137], %154 {strides = array<i32>} : memref<1x2x4xf32, #tpu.memory_space<vmem>>, vector<1x2x4xf32>,
    return
  }
  func.func @transform_0(%arg0: i32) -> (i32, i32) {
    %c0_i32 = arith.constant 0 : i32
    %c0_i32_0 = arith.constant 0 : i32
    return %arg0, %c0_i32 : i32, i32
  }
  func.func @transform_1(%arg0: i32) -> (i32, i32) {
    %c0_i32 = arith.constant 0 : i32
    %c0_i32_0 = arith.constant 0 : i32
    %c0_i32_1 = arith.constant 0 : i32
    return %c0_i32, %c0_i32_0 : i32, i32
  }
  func.func @transform_2(%arg0: i32) -> (i32, i32) {
    %c0_i32 = arith.constant 0 : i32
    %c0_i32_0 = arith.constant 0 : i32
    %c0_i32_1 = arith.constant 0 : i32
    return %c0_i32, %c0_i32_0 : i32, i32
  }
  func.func @transform_3(%arg0: i32) -> (i32, i32, i32) {
    %c0_i32 = arith.constant 0 : i32
    %c0_i32_0 = arith.constant 0 : i32
    %c0_i32_1 = arith.constant 0 : i32
    %c0_i32_2 = arith.constant 0 : i32
    return %c0_i32, %c0_i32_0, %c0_i32_1 : i32, i32, i32
  }
  func.func @transform_4(%arg0: i32) -> (i32, i32) {
    %c0_i32 = arith.constant 0 : i32
    %c0_i32_0 = arith.constant 0 : i32
    %c0_i32_1 = arith.constant 0 : i32
    return %c0_i32, %c0_i32_0 : i32, i32
  }
  func.func @transform_5(%arg0: i32) -> (i32, i32, i32) {
    %c0_i32 = arith.constant 0 : i32
    %c0_i32_0 = arith.constant 0 : i32
    %c0_i32_1 = arith.constant 0 : i32
    %c0_i32_2 = arith.constant 0 : i32
    return %c0_i32, %c0_i32_0, %c0_i32_1 : i32, i32, i32
  }
  func.func @transform_6(%arg0: i32) -> (i32, i32) {
    %c0_i32 = arith.constant 0 : i32
    %c0_i32_0 = arith.constant 0 : i32
    %c0_i32_1 = arith.constant 0 : i32
    return %c0_i32, %c0_i32_0 : i32, i32
  }
  func.func @transform_7(%arg0: i32) -> (i32, i32) {
    %c0_i32 = arith.constant 0 : i32
    %c0_i32_0 = arith.constant 0 : i32
    %c0_i32_1 = arith.constant 0 : i32
    return %c0_i32, %c0_i32_0 : i32, i32
  }
  func.func @transform_8(%arg0: i32) -> (i32, i32) {
    %c0_i32 = arith.constant 0 : i32
    %c0_i32_0 = arith.constant 0 : i32
    %c0_i32_1 = arith.constant 0 : i32
    return %c0_i32, %c0_i32_0 : i32, i32
  }
  func.func @transform_9(%arg0: i32) -> (i32, i32) {
    %c0_i32 = arith.constant 0 : i32
    %c0_i32_0 = arith.constant 0 : i32
    %c0_i32_1 = arith.constant 0 : i32
    return %c0_i32, %c0_i32_0 : i32, i32
  }
  func.func @transform_10(%arg0: i32) -> (i32, i32) {
    %c0_i32 = arith.constant 0 : i32
    %c0_i32_0 = arith.constant 0 : i32
    %c0_i32_1 = arith.constant 0 : i32
    return %c0_i32, %c0_i32_0 : i32, i32
  }
  func.func @transform_11(%arg0: i32) -> (i32, i32, i32) {
    %c0_i32 = arith.constant 0 : i32
    %c0_i32_0 = arith.constant 0 : i32
    %c0_i32_1 = arith.constant 0 : i32
    return %arg0, %c0_i32, %c0_i32_0 : i32, i32, i32
  }
}

</mosaic_0001>

<bundles_post_ra>
// kernel: tpu_custom_call.1
= control target key start
LH: loop header
LB: loop body
LE: loop exit
PB: predicated region body
PF: predicated region fallthrough
CT: control target
= control target key end

     0   :  { %s3591_s0 = inlined_call_operand.vmem [shape: bf16[128,20], index: 0, kind: input, shape index: {}]   ;;  %s3592_s1 = inlined_call_operand.vmem [shape: bf16[20,128], index: 1, kind: input, shape index: {}]   ;;  %s3593_s2 = inlined_call_operand.vmem [shape: f32[1,128], index: 2, kind: input, shape index: {}]   ;;  %s3594_s3 = inlined_call_operand.vmem [shape: bf16[5,128,128], index: 3, kind: input, shape index: {}]   ;;  %s3595_s4 = inlined_call_operand.vmem [shape: f32[1,128], index: 4, kind: input, shape index: {}]   ;;  %s3596_s5 = inlined_call_operand.hbm [shape: bf16[5,128,128], index: 5, kind: input, shape index: {}]   ;;  %s3597_s6 = inlined_call_operand.vmem [shape: f32[1,128], index: 6, kind: input, shape index: {}]   ;;  %s3598_s7 = inlined_call_operand.vmem [shape: f32[128,64], index: 7, kind: input, shape index: {}]   ;;  %s3599_s8 = inlined_call_operand.vmem [shape: f32[1,64], index: 8, kind: input, shape index: {}]   ;;  %s3600_s9 = inlined_call_operand.vmem [shape: f32[64,4], index: 9, kind: input, shape index: {}]   ;;  %s3601_s10 = inlined_call_operand.vmem [shape: f32[1,4], index: 10, kind: input, shape index: {}]   ;;  %s3602_s11 = inlined_call_operand.hbm [shape: f32[2,2,4], index: 11, kind: output, shape index: {}]  }
   0x1   :  { %3603 = sst [smem:[#allocation13_spill]] %s3591_s0 }
   0x2   :  { %3604 = sst [smem:[#allocation14_spill]] %s3592_s1 }
   0x3   :  { %16 = vsyncpa [#allocation8], 0 }
   0x4   :  { %17 = vsyncpa [#allocation9], 0 }
   0x5   :  { %19 = vsyncpa [#allocation9 + $0x1], 0  ;;  %s3125_s17 = smov 0   ;;  %s3127_s18 = smov 0  }
   0x6   :  { %s3129_s19 = smov 0   ;;  %s3131_s20 = smov 0  }
   0x7 LB: > { %s3146_s21 = sadd.s32 4294967295, %s3057_s20   ;;  %s2205_s22 = sadd.s32 4294967294, %s3057_s20   ;;  %s3057_s20 = sphi %s3131_s20, %s3614_s20   ;;  %s3053_s19 = sphi %s3129_s19, %s3613_s19   ;;  %s3049_s18 = sphi %s3127_s18, %s3612_s18   ;;  %s3045_s17 = sphi %s3125_s17, %s3611_s17  }
   0x8   : > { %s3150_s23 = sadd.s32 1, %s3057_s20   ;;  %s268_s24 = sadd.s32 1, %s3053_s19 }
   0x9   : > { %s265_s25 = ssub.s32 %s3057_s20, %s3150_s23  ;;  %p278_p0 = scmp.ne.s32.totalorder %s3053_s19, %s3049_s18 }
   0xa   : > { %p266_p1 = scmp.eq.s32.totalorder %s265_s25, 0  ;;  %p279_p2 = scmp.eq.s32.totalorder %s3146_s21, 1 }
   0xb   : > { %p284_p3 = scmp.ne.s32.totalorder %s3049_s18, %s3045_s17  ;;  %p285_p4 = scmp.eq.s32.totalorder %s2205_s22, 1 }
   0xc   : > { %s3161_s26 = scalar_select %p266_p1, %s3053_s19, %s268_s24  }
   0xd   : > { %p3163_p5 = por %p279_p2, %p278_p0  ;;  %p3167_p6 = por %p285_p4, %p284_p3 }
   0xe   : > { %p2206_p7 = scmp.ge.s32.totalorder %s3057_s20, 1  ;;  %p292_p8 = scmp.lt.s32.totalorder %s3057_s20, 3 }
   0xf   : > { %s3606_s28 = scalar_select %p3167_p6, 1, 0 }
  0x10   : > { %p2836_p9 = scmp.eq.s32.totalorder %s3146_s21, 0  ;;  %p3174_p10 = pnand %p2206_p7, %p292_p8 }
  0x11   : > { %s3059_s30 = smov [#allocation7]  }
  0x12   : > { %s316_s12 = sshll.u32 %s3059_s30, 4  ;;  %p2828_p11 = pneg %p3174_p10  ;;  %s317_s12 = int_to_ptr.vmem [resolvable:$true] %s316_s12 }
  0x13   : > { %s2978_s13 = scalar_lea.vmem %s317_s12, 5120  ;;  %p2986_p3 = scmp.lt.s32.totalorder %s317_s12, %s317_s12 }
  0x14   : > { %p2829_p12 = pnand %p2836_p9, %p2828_p11  ;;  %p2979_p0 = scmp.ne.s32.totalorder %s317_s12, %s2978_s13 }
  0x15   : > { %p2987_p4 = scmp.lt.s32.totalorder %s2978_s13, %s2978_s13 }
  0x16   : > { %p2969_p13 = pneg %p2829_p12 }
  0x17   : > { %p2988_p6 = por %p2987_p4, %p2986_p3 }
  0x18   : > { %p2981_p1 = pnand %p2979_p0, %p2969_p13 }
  0x1a   : > { %p2982_p2 = pneg %p2981_p1 }
  0x1c   : > { %p2989_p7 = pnand %p2988_p6, %p2982_p2 }
  0x1e   : > { %2992 = shalt.err (!%p2989_p7)
}
  0x1f   : > { %s3060_s14 = smov 64   ;;  %s3061_s15 = smov 4  }
  0x20   : > { %2831 = dma.hbm_to_vmem [thread:$0]  (!%p2829_p12), %s3596_s5, 5120, %s317_s12, [#allocation8], %s3060_s14, %s3060_s14, %s3061_s15  }
  0x21   : > { %356 = sbr.rel (%p3174_p10) target bundleno = 1591 (0x637), region = 64 }
  0x26   : > { %3036 = dma.done.wait (%p2836_p9), [#allocation8], 5120  }
  0x27   : > { %3038 = vsyncadd (%p2836_p9), [#allocation8], 4294962176  ;;  %s2212_s24 = sshll.u32 %s3146_s21, 3  ;;  %v3062_v0 = vmov 0.0   ;;  %vm469_vm0 = vcmask 1041408   ;;  %s3608_s0 = sld [smem:[#allocation13_spill]] }
  0x28   : > { %p397_p8 = scmp.lt.s32.totalorder %s2212_s24, 15  ;;  %2527 = vmatprep.subr.bf16.mxu1 %v3062_v0  ;;  %403 = vst [vmem:[#allocation3] sm:$0xff] %v3062_v0  ;;  %404 = vst [vmem:[#allocation5] sm:$0xff] %v3062_v0  ;;  %vm456_vm1 = vcmask 162816   ;;  %s3609_s1 = sld [smem:[#allocation14_spill]]  ;;  %v2882_v7 = vld [vmem:[%s3594_s3 + $0x78] sm:$0xff]  }
  0x29   : > { %405 = vst [vmem:[#allocation3 + $0x18] sm:$0xff] %v3062_v0  ;;  %406 = vst [vmem:[#allocation5 + $0x10] sm:$0xff] %v3062_v0  ;;  %v2883_v8 = vld [vmem:[%s3594_s3 + $0x38] sm:$0xff]   ;;  %2528 = vmatpush3.bf16.msra.mxu1 %v2882_v7  ;;  %v2884_v10 = vld [vmem:[%s3594_s3 + $0x70] sm:$0xff]   ;;  %vm3063_vm2 = vmmov 0   ;;  %vm1921_vm3 = vcmask 1040384  }
  0x2a   : > { %407 = vst [vmem:[#allocation3 + $0x30] sm:$0xff] %v3062_v0  ;;  %408 = vst [vmem:[#allocation5 + $0x20] sm:$0xff] %v3062_v0  ;;  %s3616_s24 = smov (!%p397_p8, %s2212_s24), 15  ;;  %2529 = vmatprep.subr.bf16.mxu1 %v3062_v0  ;;  %v2885_v11 = vld [vmem:[%s3594_s3 + $0x30] sm:$0xff]   ;;  %v2886_v12 = vld [vmem:[%s3594_s3 + $0x68] sm:$0xff]   ;;  %2543 = vmatprep.mubr.msk.bf16.mxu1 %vm3063_vm2, %v3062_v0  ;;  %vm2032_vm4 = vcmask 523264  }
  0x2b   : > { %s2213_s25 = sshll.u32 %s3616_s24, 2  ;;  %v2887_v13 = vld [vmem:[%s3594_s3 + $0x28] sm:$0xff]   ;;  %v2888_v14 = vld [vmem:[%s3594_s3 + $0x60] sm:$0xff]   ;;  %v2890_v16 = vld [vmem:[%s3594_s3 + $0x58] sm:$0xff]   ;;  %vm2106_vm5 = vcmask 25600   ;;  %s393_s16 = sand.u32 1, %s3049_s18  }
  0x2c   : > { %v2889_v15 = vld [vmem:[%s3594_s3 + $0x20] sm:$0xff]   ;;  %v2891_v17 = vld [vmem:[%s3594_s3 + $0x18] sm:$0xff]   ;;  %v2892_v18 = vld [vmem:[%s3594_s3 + $0x50] sm:$0xff]   ;;  %s2375_s22 = sshll.u32 %s3146_s21, 5  ;;  %s2121_s14 = scalar_lea.sflag [#allocation9], %s393_s16 }
  0x2d   : > { %s400_s12 = scalar_lea.vmem %s3608_s0, %s2213_s25  ;;  %2530 = vmatpush3.bf16.msra.mxu1 %v2884_v10  ;;  %v2893_v19 = vld [vmem:[%s3594_s3 + $0x10] sm:$0xff]   ;;  %v2894_v20 = vld [vmem:[%s3594_s3 + $0x48] sm:$0xff]   ;;  %v2896_v22 = vld [vmem:[%s3594_s3 + $0x40] sm:$0xff]   ;;  %s2132_s13 = scalar_lea.hbm %s3602_s11, %s2375_s22 }
  0x2e   : > { %v2876_v1 = vld [vmem:[%s3609_s1 + $0x8] ss:$0 sps:$4 sm:$0x33]   ;;  %v2877_v2 = vld [vmem:[%s3609_s1] sm:$0xff]   ;;  %v2880_v6 = vld [vmem:[%s400_s12 + $0x10] sm:$0xff]   ;;  %2531 = vmatprep.subr.bf16.mxu1 %v3062_v0  ;;  %s3064_s0 = smov [#allocation10]  }
  0x2f   : > { %2821 = vmatprep.subr.msk.bf16.mxu0 %vm469_vm0, %v2876_v1  ;;  %v471_v3 = vsel %vm469_vm0, %v2876_v1, 0  ;;  %v2878_v4 = vld [vmem:[%s400_s12] sm:$0xff]   ;;  %v2879_v5 = vld [vmem:[%s400_s12 + $0x8] sm:$0xff]   ;;  %v2881_v9 = vld [vmem:[%s400_s12 + $0x18] sm:$0xff]   ;;  %s2211_s12 = sshll.u32 %s393_s16, 1  ;;  %s2997_s1 = sshll.u32 %s3064_s0, 4  ;;  %s2998_s1 = int_to_ptr.vmem [resolvable:$false] %s2997_s1 }
  0x30   : > { %2516 = vmatpush3.bf16.msra.mxu0 %v471_v3  ;;  %2519 = vmatprep.mubr.msk.bf16.mxu0 %vm456_vm1, %v2878_v4  ;;  %v2895_v21 = vld [vmem:[%s3594_s3 + $0x8] sm:$0xff]   ;;  %v2897_v23 = vld [vmem:[%s3594_s3] sm:$0xff]   ;;  %v2898_v61 = vld [vmem:[%s3594_s3 + $0xb8] sm:$0xff]   ;;  %s395_s24 = scalar_lea.vmem [#allocation10], %s2211_s12  ;;  %s2999_s21 = scalar_lea.vmem %s2998_s1, 64 }
  0x31   : > { %2517 = vmatprep.subr.bf16.mxu0 %v2877_v2  ;;  %2532 = vmatpush3.bf16.msra.mxu1 %v2886_v12  ;;  %v2214_v24 = vld [vmem:[%s3593_s2] ss:$0 sm:$0xff]  ;;  %v2899_v4 = vld [vmem:[%s3594_s3 + $0xf8] sm:$0xff]   ;;  %v2901_v7 = vld [vmem:[%s3594_s3 + $0xf0] sm:$0xff]   ;;  %s2134_s25 = sshll.u32 %s395_s24, 4  ;;  %s2135_s25 = int_to_ptr.vmem [resolvable:$true] %s2134_s25 }
  0x32   : > { %2533 = vmatprep.subr.bf16.mxu1 %v3062_v0  ;;  %s2993_s15 = scalar_lea.vmem %s2135_s25, 32  ;;  %p3000_p11 = scmp.lt.s32.totalorder %s2135_s25, %s2998_s1 }
  0x33   : > { %p2994_p6 = scmp.ne.s32.totalorder %s2135_s25, %s2993_s15  ;;  %p3001_p12 = scmp.lt.s32.totalorder %s2999_s21, %s2993_s15 }
  0x34   : > { %2518 = vmatpush3.bf16.msra.mxu0 %v2877_v2 }
  0x35   : > { %2555 = vmatprep.subr.bf16.mxu0 %v3062_v0  ;;  %2534 = vmatpush3.bf16.msra.mxu1 %v2888_v14  ;;  %p2995_p9 = pnand %p2994_p6, %p3163_p5  ;;  %p3002_p13 = por %p3001_p12, %p3000_p11 }
  0x36   : > { %2535 = vmatprep.subr.bf16.mxu1 %v3062_v0 }
  0x37   : > { %2520 = vmatmul.mubr.msk.bf16.vlgmr.msra.gmra.mxu0 %vm456_vm1, %v2879_v5  ;;  %p2996_p10 = pneg %p2995_p9 }
  0x38   : > { %2523 = vmatprep.mubr.msk.bf16.mxu0 %vm456_vm1, %v2880_v6  ;;  %2556 = vmatpush3.bf16.msra.mxu0 %v2883_v8  ;;  %v2900_v6 = vld [vmem:[%s3594_s3 + $0xb0] sm:$0xff]  }
  0x39   : > { %2557 = vmatprep.subr.bf16.mxu0 %v3062_v0  ;;  %2536 = vmatpush3.bf16.msra.mxu1 %v2890_v16  ;;  %v2904_v16 = vld [vmem:[%s3594_s3 + $0xa0] sm:$0xff]   ;;  %p3003_p0 = pnand %p3002_p13, %p2996_p10 }
  0x3a   : > { %2537 = vmatprep.subr.bf16.mxu1 %v3062_v0 }
  0x3c   : > { %2558 = vmatpush3.bf16.msra.mxu0 %v2885_v11 }
  0x3d   : > { %2559 = vmatprep.subr.bf16.mxu0 %v3062_v0  ;;  %2538 = vmatpush3.bf16.msra.mxu1 %v2892_v18 }
  0x3e   : > { %2539 = vmatprep.subr.bf16.mxu1 %v3062_v0 }
  0x3f   : > { %2524 = vmatmul.mubr.msk.bf16.gmra.mxu0 %vm456_vm1, %v2881_v9  ;;  %v2902_v9 = vld [vmem:[%s3594_s3 + $0xa8] sm:$0xff]  }
  0x40   : > { %2560 = vmatpush3.bf16.msra.mxu0 %v2887_v13  ;;  %2571 = vmatprep.mubr.msk.bf16.mxu0 %vm3063_vm2, %v3062_v0 }
  0x41   : > { %2561 = vmatprep.subr.bf16.mxu0 %v3062_v0  ;;  %2540 = vmatpush3.bf16.msra.mxu1 %v2894_v20  ;;  %v2906_v20 = vld [vmem:[%s3594_s3 + $0x98] sm:$0xff]  }
  0x42   : > { %2541 = vmatprep.subr.bf16.mxu1 %v3062_v0 }
  0x44   : > { %2562 = vmatpush3.bf16.msra.mxu0 %v2889_v15  ;;  %v2903_v15 = vld [vmem:[%s3594_s3 + $0xe8] sm:$0xff]  }
  0x45   : > { %2563 = vmatprep.subr.bf16.mxu0 %v3062_v0  ;;  %2542 = vmatpush3.bf16.msra.mxu1 %v2896_v22  ;;  %v2907_v22 = vld [vmem:[%s3594_s3 + $0xd8] sm:$0xff]  }
  0x46   : > { %2583 = vmatprep.subr.bf16.mxu1 %v3062_v0 }
  0x48   : > { %2564 = vmatpush3.bf16.msra.mxu0 %v2891_v17  ;;  %v2905_v17 = vld [vmem:[%s3594_s3 + $0xe0] sm:$0xff]  }
  0x49   : > { %2565 = vmatprep.subr.bf16.mxu0 %v3062_v0 }
  0x4c   : > { %2566 = vmatpush3.bf16.msra.mxu0 %v2893_v19 }
  0x4d   : > { %2567 = vmatprep.subr.bf16.mxu0 %v3062_v0 }
  0x50   : > { %2568 = vmatpush3.bf16.msra.mxu0 %v2895_v21 }
  0x51   : > { %2569 = vmatprep.subr.bf16.mxu0 %v3062_v0 }
  0x54   : > { %2570 = vmatpush3.bf16.msra.mxu0 %v2897_v23 }
  0x55   : > { %2611 = vmatprep.subr.bf16.mxu0 %v3062_v0 }
  0xf7   : > { %v2521_v25 = vpop.f32.mrf.mxu0 }
  0xf8   : > { %v516_v26 = vadd.f32 %v2521_v25, %v2214_v24  ;;  %v2909_v25 = vld [vmem:[%s3594_s3 + $0xd0] sm:$0xff]  }
  0xf9   : > { %v507_v27 = vpop.f32.mrf.mxu0 }
  0xfa   : > { %v540_v28 = vmax.f32 %v516_v26, 0.0  ;;  %v508_v29 = vadd.f32 %v2214_v24, %v507_v27  ;;  %v2910_v26 = vld [vmem:[%s3594_s3 + $0x88] sm:$0xff]  }
  0xfb   : > { %v2522_v30 = vpop.f32.mrf.mxu0  ;;  %v2911_v27 = vld [vmem:[%s3594_s3 + $0xc8] sm:$0xff]  }
  0xfc   : > { %548 = vst [vmem:[#allocation2 + $0x10] sm:$0xff] %v540_v28  ;;  %v538_v31 = vmax.f32 %v508_v29, 0.0  ;;  %v519_v32 = vadd.f32 %v2522_v30, %v2214_v24  ;;  %v2912_v28 = vld [vmem:[%s3594_s3 + $0x80] sm:$0xff]  }
  0xfd   : > { %v510_v33 = vpop.f32.mrf.mxu0  ;;  %v2913_v29 = vld [vmem:[%s3594_s3 + $0xc0] sm:$0xff]  }
  0xfe   : > { %546 = vst [vmem:[#allocation2] sm:$0xff] %v538_v31  ;;  %v541_v34 = vmax.f32 %v519_v32, 0.0  ;;  %v511_v35 = vadd.f32 %v2214_v24, %v510_v33  ;;  %v2914_v31 = vld [vmem:[%s3594_s3 + $0x138] sm:$0xff]  }
  0xff   : > { %v2525_v36 = vpop.f32.mrf.mxu0 }
 0x100   : > { %549 = vst [vmem:[#allocation2 + $0x18] sm:$0xff] %v541_v34  ;;  %v539_v37 = vmax.f32 %v511_v35, 0.0  ;;  %v532_v38 = vadd.f32 %v2525_v36, %v2214_v24  ;;  %v2915_v35 = vld [vmem:[%s3594_s3 + $0x130] sm:$0xff]  }
 0x101   : > { %v523_v39 = vpop.f32.mrf.mxu0 }
 0x102   : > { %547 = vst [vmem:[#allocation2 + $0x8] sm:$0xff] %v539_v37  ;;  %v544_v40 = vmax.f32 %v532_v38, 0.0  ;;  %v524_v41 = vadd.f32 %v2214_v24, %v523_v39  ;;  %v2916_v38 = vld [vmem:[%s3594_s3 + $0x128] sm:$0xff]  }
 0x103   : > { %v2526_v42 = vpop.f32.mrf.mxu0 }
 0x104   : > { %552 = vst [vmem:[#allocation2 + $0x30] sm:$0xff] %v544_v40  ;;  %v542_v43 = vmax.f32 %v524_v41, 0.0  ;;  %v535_v44 = vadd.f32 %v2526_v42, %v2214_v24  ;;  %v2917_v41 = vld [vmem:[%s3594_s3 + $0x120] sm:$0xff]  }
 0x105   : > { %v526_v45 = vpop.f32.mrf.mxu0 }
 0x106   : > { %550 = vst [vmem:[#allocation2 + $0x20] sm:$0xff] %v542_v43  ;;  %v545_v46 = vmax.f32 %v535_v44, 0.0  ;;  %v527_v47 = vadd.f32 %v2214_v24, %v526_v45  ;;  %v2908_v24 = vld [vmem:[%s3594_s3 + $0x90] sm:$0xff]   ;;  %v2918_v43 = vld [vmem:[%s3594_s3 + $0x118] sm:$0xff]  }
 0x107   : > { %v556_v48 = vld [vmem:[#allocation2 + $0x10] ss:$2 sm:$0xff]  ;;  %v560_v49 = vld [vmem:[#allocation2 + $0x11] ss:$2 sm:$0xff] }
 0x108   : > { %v3286_v50 = vmax.f32 %v556_v48, %v560_v49  ;;  %553 = vst [vmem:[#allocation2 + $0x38] sm:$0xff] %v545_v46  ;;  %v543_v51 = vmax.f32 %v527_v47, 0.0  ;;  %v2919_v46 = vld [vmem:[%s3594_s3 + $0x110] sm:$0xff]   ;;  %v2920_v47 = vld [vmem:[%s3594_s3 + $0x108] sm:$0xff]   ;;  %v2921_v48 = vld [vmem:[%s3594_s3 + $0x100] sm:$0xff]  }
 0x109   : > { %v554_v52 = vld [vmem:[#allocation2] ss:$2 sm:$0xff]  ;;  %v558_v53 = vld [vmem:[#allocation2 + $0x1] ss:$2 sm:$0xff] }
 0x10a   : > { %564 = vst [vmem:[#allocation3 + $0x10] sm:$0xff] %v3286_v50  ;;  %v3289_v54 = vmax.f32 %v554_v52, %v558_v53  ;;  %551 = vst [vmem:[#allocation2 + $0x28] sm:$0xff] %v543_v51 }
 0x10c   : > { %563 = vst [vmem:[#allocation3 + $0x8] sm:$0xff] %v3289_v54  ;;  %v839_v32 = vpack.c.bf16 %v3286_v50, %v3289_v54 }
 0x10f   : > { %v568_v55 = vld [vmem:[#allocation2 + $0x30] ss:$2 sm:$0xff]  ;;  %v572_v56 = vld [vmem:[#allocation2 + $0x31] ss:$2 sm:$0xff] }
 0x110   : > { %v3292_v57 = vmax.f32 %v568_v55, %v572_v56 }
 0x111   : > { %v566_v58 = vld [vmem:[#allocation2 + $0x20] ss:$2 sm:$0xff]  ;;  %v570_v59 = vld [vmem:[#allocation2 + $0x21] ss:$2 sm:$0xff]  ;;  %v603_v8 = vld [vmem:[#allocation3 + $0x17] sm:$0xff] }
 0x112   : > { %576 = vst [vmem:[#allocation3 + $0x28] sm:$0xff] %v3292_v57  ;;  %v3295_v60 = vmax.f32 %v566_v58, %v570_v59  ;;  %v579_v11 = vld [vmem:[#allocation3 + $0x16] sm:$0xff]  ;;  %v841_v44 = vpack.c.bf16 %v3292_v57, %v3292_v57 }
 0x113   : > { %v601_v62 = vld [vmem:[#allocation3 + $0x7] sm:$0xff]  ;;  %v602_v63 = vld [vmem:[#allocation3 + $0xf] sm:$0xff]  ;;  %v2922_v57 = vld [vmem:[#allocation7 + $0x78] sm:$0xff]  }
 0x114   : > { %v577_v1 = vld [vmem:[#allocation3 + $0x6] sm:$0xff]  ;;  %575 = vst [vmem:[#allocation3 + $0x20] sm:$0xff] %v3295_v60  ;;  %v606_v2 = vpack.c.bf16 %v602_v63, %v601_v62  ;;  %v578_v3 = vld [vmem:[#allocation3 + $0xe] sm:$0xff]  ;;  %v840_v39 = vpack.c.bf16 %v3295_v60, %v3062_v0  ;;  %v2923_v58 = vld [vmem:[#allocation7 + $0x38] sm:$0xff]  }
 0x115   : > { %v582_v5 = vpack.c.bf16 %v578_v3, %v577_v1  ;;  %v968_v30 = vld [vmem:[#allocation3 + $0x9] sm:$0xff]  ;;  %v969_v33 = vld [vmem:[#allocation3 + $0x11] sm:$0xff]  ;;  %v2929_v63 = vld [vmem:[#allocation7 + $0x20] sm:$0xff]  }
 0x116   : > { %2544 = vmatmul.mubr.bf16.vlgmr.msra.gmra.mxu1 %v606_v2  ;;  %v973_v34 = vpack.c.bf16 %v969_v33, %v968_v30  ;;  %v1102_v49 = vld [vmem:[#allocation3 + $0xa] sm:$0xff]  ;;  %v1103_v50 = vld [vmem:[#allocation3 + $0x12] sm:$0xff] }
 0x117   : > { %2572 = vmatmul.mubr.bf16.vlgmr.msra.gmra.mxu0 %v582_v5  ;;  %2584 = vmatpush3.bf16.msra.mxu1 %v2898_v61  ;;  %v1107_v51 = vpack.c.bf16 %v1103_v50, %v1102_v49  ;;  %v2924_v59 = vld [vmem:[#allocation7 + $0x70] sm:$0xff]   ;;  %v2926_v61 = vld [vmem:[#allocation7 + $0x68] sm:$0xff]   ;;  %v2930_v1 = vld [vmem:[#allocation7 + $0x58] sm:$0xff]  }
 0x118   : > { %2612 = vmatpush3.bf16.msra.mxu0 %v2899_v4  ;;  %2585 = vmatprep.subr.bf16.mxu1 %v3062_v0  ;;  %v2925_v60 = vld [vmem:[#allocation7 + $0x30] sm:$0xff]   ;;  %v2927_v62 = vld [vmem:[#allocation7 + $0x28] sm:$0xff]   ;;  %v2931_v2 = vld [vmem:[#allocation7 + $0x18] sm:$0xff]  }
 0x119   : > { %2613 = vmatprep.subr.bf16.mxu0 %v3062_v0  ;;  %2547 = vmatprep.mubr.msk.bf16.mxu1 %vm3063_vm2, %v3062_v0  ;;  %v972_v42 = vld [vmem:[#allocation3 + $0x29] sm:$0xff] }
 0x11a   : > { %2575 = vmatprep.mubr.msk.bf16.mxu0 %vm3063_vm2, %v3062_v0  ;;  %v975_v45 = vpack.c.bf16 %v972_v42, %v972_v42  ;;  %v1106_v55 = vld [vmem:[#allocation3 + $0x2a] sm:$0xff] }
 0x11b   : > { %2586 = vmatpush3.bf16.msra.mxu1 %v2900_v6  ;;  %v604_v10 = vld [vmem:[#allocation3 + $0x1f] sm:$0xff]  ;;  %v605_v18 = vld [vmem:[#allocation3 + $0x27] sm:$0xff]  ;;  %v1109_v56 = vpack.c.bf16 %v1106_v55, %v1106_v55  ;;  %v2932_v3 = vld [vmem:[#allocation7 + $0x50] sm:$0xff]  }
 0x11c   : > { %v580_v12 = vld [vmem:[#allocation3 + $0x1e] sm:$0xff]  ;;  %2614 = vmatpush3.bf16.msra.mxu0 %v2901_v7  ;;  %2587 = vmatprep.subr.bf16.mxu1 %v3062_v0  ;;  %v607_v13 = vpack.c.bf16 %v604_v10, %v603_v8  ;;  %v581_v19 = vld [vmem:[#allocation3 + $0x26] sm:$0xff]  ;;  %v608_v21 = vpack.c.bf16 %v605_v18, %v605_v18  ;;  %v2933_v4 = vld [vmem:[#allocation7 + $0x10] sm:$0xff]  }
 0x11d   : > { %v583_v14 = vpack.c.bf16 %v580_v12, %v579_v11  ;;  %2615 = vmatprep.subr.bf16.mxu0 %v3062_v0  ;;  %v584_v23 = vpack.c.bf16 %v581_v19, %v581_v19  ;;  %v970_v36 = vld [vmem:[#allocation3 + $0x19] sm:$0xff]  ;;  %v971_v37 = vld [vmem:[#allocation3 + $0x21] sm:$0xff] }
 0x11e   : > { %2548 = vmatmul.mubr.bf16.gmra.mxu1 %v607_v13  ;;  %v974_v40 = vpack.c.bf16 %v971_v37, %v970_v36  ;;  %v1104_v52 = vld [vmem:[#allocation3 + $0x1a] sm:$0xff]  ;;  %v1105_v53 = vld [vmem:[#allocation3 + $0x22] sm:$0xff] }
 0x11f   : > { %2576 = vmatmul.mubr.bf16.gmra.mxu0 %v583_v14  ;;  %2588 = vmatpush3.bf16.msra.mxu1 %v2902_v9  ;;  %v1108_v54 = vpack.c.bf16 %v1105_v53, %v1104_v52  ;;  %v2934_v5 = vld [vmem:[#allocation7 + $0x48] sm:$0xff]   ;;  %v2936_v7 = vld [vmem:[#allocation7 + $0x40] sm:$0xff]   ;;  %v3424_v9 = vld [vmem:[#allocation7 + $0xb8] sm:$0xff]  }
 0x120   : > { %2616 = vmatpush3.bf16.msra.mxu0 %v2903_v15  ;;  %2589 = vmatprep.subr.bf16.mxu1 %v3062_v0  ;;  %v2935_v6 = vld [vmem:[#allocation7 + $0x8] sm:$0xff]   ;;  %v2937_v8 = vld [vmem:[#allocation7] sm:$0xff]   ;;  %v3426_v10 = vld [vmem:[#allocation7 + $0xf8] sm:$0xff]  }
 0x121   : > { %2617 = vmatprep.subr.bf16.mxu0 %v3062_v0  ;;  %2551 = vmatprep.mubr.msk.bf16.mxu1 %vm3063_vm2, %v3062_v0 }
 0x122   : > { %2579 = vmatprep.mubr.msk.bf16.mxu0 %vm3063_vm2, %v3062_v0 }
 0x123   : > { %2590 = vmatpush3.bf16.msra.mxu1 %v2904_v16 }
 0x124   : > { %2618 = vmatpush3.bf16.msra.mxu0 %v2905_v17  ;;  %2591 = vmatprep.subr.bf16.mxu1 %v3062_v0 }
 0x125   : > { %2619 = vmatprep.subr.bf16.mxu0 %v3062_v0 }
 0x126   : > { %2552 = vmatmul.mubr.bf16.gmra.mxu1 %v608_v21 }
 0x127   : > { %2580 = vmatmul.mubr.bf16.gmra.mxu0 %v584_v23  ;;  %2592 = vmatpush3.bf16.msra.mxu1 %v2906_v20 }
 0x128   : > { %2620 = vmatpush3.bf16.msra.mxu0 %v2907_v22  ;;  %2593 = vmatprep.subr.bf16.mxu1 %v3062_v0 }
 0x129   : > { %2621 = vmatprep.subr.bf16.mxu0 %v3062_v0  ;;  %2599 = vmatprep.mubr.msk.bf16.mxu1 %vm3063_vm2, %v3062_v0 }
 0x12a   : > { %2627 = vmatprep.mubr.msk.bf16.mxu0 %vm3063_vm2, %v3062_v0 }
 0x12b   : > { %2594 = vmatpush3.bf16.msra.mxu1 %v2908_v24 }
 0x12c   : > { %2622 = vmatpush3.bf16.msra.mxu0 %v2909_v25  ;;  %2595 = vmatprep.subr.bf16.mxu1 %v3062_v0 }
 0x12d   : > { %2623 = vmatprep.subr.bf16.mxu0 %v3062_v0 }
 0x12f   : > { %2596 = vmatpush3.bf16.msra.mxu1 %v2910_v26 }
 0x130   : > { %2624 = vmatpush3.bf16.msra.mxu0 %v2911_v27  ;;  %2597 = vmatprep.subr.bf16.mxu1 %v3062_v0 }
 0x131   : > { %2625 = vmatprep.subr.bf16.mxu0 %v3062_v0 }
 0x133   : > { %2598 = vmatpush3.bf16.msra.mxu1 %v2912_v28 }
 0x134   : > { %2626 = vmatpush3.bf16.msra.mxu0 %v2913_v29  ;;  %2639 = vmatprep.subr.bf16.mxu1 %v3062_v0 }
 0x135   : > { %2667 = vmatprep.subr.bf16.mxu0 %v2922_v57 }
 0x136   : > { %2600 = vmatmul.mubr.bf16.vlgmr.msra.gmra.mxu1 %v839_v32 }
 0x137   : > { %2628 = vmatmul.mubr.bf16.vlgmr.msra.gmra.mxu0 %v973_v34  ;;  %2640 = vmatpush3.bf16.msra.mxu1 %v2914_v31 }
 0x138   : > { %2641 = vmatprep.subr.bf16.mxu1 %v3062_v0  ;;  %2603 = vmatprep.mubr.msk.bf16.mxu1 %vm3063_vm2, %v3062_v0 }
 0x139   : > { %2631 = vmatprep.mubr.msk.bf16.mxu0 %vm3063_vm2, %v3062_v0  ;;  %2668 = vmatpush3.bf16.msra.mxu0 %v2922_v57 }
 0x13a   : > { %2669 = vmatprep.subr.bf16.mxu0 %v2924_v59 }
 0x13b   : > { %2642 = vmatpush3.bf16.msra.mxu1 %v2915_v35 }
 0x13c   : > { %2643 = vmatprep.subr.bf16.mxu1 %v3062_v0 }
 0x13d   : > { %2670 = vmatpush3.bf16.msra.mxu0 %v2924_v59 }
 0x13e   : > { %2604 = vmatmul.mubr.bf16.gmra.mxu1 %v840_v39  ;;  %2671 = vmatprep.subr.bf16.mxu0 %v2926_v61 }
 0x13f   : > { %2632 = vmatmul.mubr.bf16.gmra.mxu0 %v974_v40  ;;  %2644 = vmatpush3.bf16.msra.mxu1 %v2916_v38 }
 0x140   : > { %2645 = vmatprep.subr.bf16.mxu1 %v3062_v0  ;;  %2607 = vmatprep.mubr.msk.bf16.mxu1 %vm3063_vm2, %v3062_v0 }
 0x141   : > { %2635 = vmatprep.mubr.msk.bf16.mxu0 %vm3063_vm2, %v3062_v0  ;;  %2672 = vmatpush3.bf16.msra.mxu0 %v2926_v61 }
 0x143   : > { %2646 = vmatpush3.bf16.msra.mxu1 %v2917_v41 }
 0x144   : > { %2647 = vmatprep.subr.bf16.mxu1 %v3062_v0 }
 0x146   : > { %2608 = vmatmul.mubr.bf16.gmra.mxu1 %v841_v44 }
 0x147   : > { %2636 = vmatmul.mubr.bf16.gmra.mxu0 %v975_v45  ;;  %2648 = vmatpush3.bf16.msra.mxu1 %v2918_v43 }
 0x148   : > { %2649 = vmatprep.subr.bf16.mxu1 %v3062_v0  ;;  %2655 = vmatprep.mubr.msk.bf16.mxu1 %vm3063_vm2, %v3062_v0 }
 0x14b   : > { %2650 = vmatpush3.bf16.msra.mxu1 %v2919_v46 }
 0x14c   : > { %2651 = vmatprep.subr.bf16.mxu1 %v3062_v0 }
 0x14f   : > { %2652 = vmatpush3.bf16.msra.mxu1 %v2920_v47 }
 0x150   : > { %2653 = vmatprep.subr.bf16.mxu1 %v3062_v0 }
 0x153   : > { %2654 = vmatpush3.bf16.msra.mxu1 %v2921_v48 }
 0x154   : > { %2687 = vmatprep.subr.bf16.mxu1 %v2923_v58 }
 0x156   : > { %2656 = vmatmul.mubr.bf16.vlgmr.msra.gmra.mxu1 %v1107_v51 }
 0x157   : > { %2659 = vmatprep.mubr.msk.bf16.mxu1 %vm3063_vm2, %v3062_v0  ;;  %2688 = vmatpush3.bf16.msra.mxu1 %v2923_v58 }
 0x158   : > { %2689 = vmatprep.subr.bf16.mxu1 %v2925_v60 }
 0x15b   : > { %2690 = vmatpush3.bf16.msra.mxu1 %v2925_v60 }
 0x15c   : > { %2691 = vmatprep.subr.bf16.mxu1 %v2927_v62 }
 0x15e   : > { %2660 = vmatmul.mubr.bf16.gmra.mxu1 %v1108_v54 }
 0x15f   : > { %2663 = vmatprep.mubr.msk.bf16.mxu1 %vm3063_vm2, %v3062_v0  ;;  %2692 = vmatpush3.bf16.msra.mxu1 %v2927_v62  ;;  %v2928_v0 = vld [vmem:[#allocation7 + $0x60] sm:$0xff]  }
 0x160   : > { %2673 = vmatprep.subr.bf16.mxu0 %v2928_v0  ;;  %2693 = vmatprep.subr.bf16.mxu1 %v2929_v63 }
 0x161   : > { %2674 = vmatpush3.bf16.msra.mxu0 %v2928_v0 }
 0x162   : > { %2675 = vmatprep.subr.bf16.mxu0 %v2930_v1 }
 0x163   : > { %2694 = vmatpush3.bf16.msra.mxu1 %v2929_v63 }
 0x164   : > { %2695 = vmatprep.subr.bf16.mxu1 %v2931_v2 }
 0x165   : > { %2676 = vmatpush3.bf16.msra.mxu0 %v2930_v1  ;;  %v2329_v1 = vld [vmem:[%s3595_s4] ss:$0 sm:$0xff] }
 0x166   : > { %2664 = vmatmul.mubr.bf16.gmra.mxu1 %v1109_v56  ;;  %2677 = vmatprep.subr.bf16.mxu0 %v2932_v3 }
 0x167   : > { %2696 = vmatpush3.bf16.msra.mxu1 %v2931_v2 }
 0x168   : > { %2697 = vmatprep.subr.bf16.mxu1 %v2933_v4 }
 0x169   : > { %2678 = vmatpush3.bf16.msra.mxu0 %v2932_v3 }
 0x16a   : > { %2679 = vmatprep.subr.bf16.mxu0 %v2934_v5 }
 0x16b   : > { %2698 = vmatpush3.bf16.msra.mxu1 %v2933_v4 }
 0x16c   : > { %2699 = vmatprep.subr.bf16.mxu1 %v2935_v6 }
 0x16d   : > { %2680 = vmatpush3.bf16.msra.mxu0 %v2934_v5 }
 0x16e   : > { %2681 = vmatprep.subr.bf16.mxu0 %v2936_v7 }
 0x16f   : > { %2700 = vmatpush3.bf16.msra.mxu1 %v2935_v6 }
 0x170   : > { %2701 = vmatprep.subr.bf16.mxu1 %v2937_v8 }
 0x171   : > { %2682 = vmatpush3.bf16.msra.mxu0 %v2936_v7 }
 0x172   : > { %2707 = vmatprep.subr.bf16.mxu0 %v3424_v9 }
 0x173   : > { %2702 = vmatpush3.bf16.msra.mxu1 %v2937_v8 }
 0x174   : > { %2727 = vmatprep.subr.bf16.mxu1 %v3426_v10 }
 0x1d6   : > { %v708_v11 = vpop.f32.mrf.mxu1 }
 0x1d7   : > { %v812_v12 = vpop.f32.mrf.mxu0 }
 0x1d8   : > { %v2545_v13 = vpop.f32.mrf.mxu1  ;;  %v813_v59 = vadd.f32 %v812_v12, %v708_v11 }
 0x1d9   : > { %v2573_v14 = vpop.f32.mrf.mxu0 }
 0x1da   : > { %v711_v15 = vpop.f32.mrf.mxu1 }
 0x1db   : > { %v815_v16 = vpop.f32.mrf.mxu0 }
 0x1dc   : > { %v2546_v17 = vpop.f32.mrf.mxu1  ;;  %v816_v61 = vadd.f32 %v815_v16, %v711_v15 }
 0x1dd   : > { %v2574_v18 = vpop.f32.mrf.mxu0 }
 0x1de   : > { %v716_v19 = vpop.f32.mrf.mxu1 }
 0x1df   : > { %v820_v20 = vpop.f32.mrf.mxu0 }
 0x1e0   : > { %v2549_v21 = vpop.f32.mrf.mxu1 }
 0x1e1   : > { %v2577_v22 = vpop.f32.mrf.mxu0 }
 0x1e2   : > { %v719_v23 = vpop.f32.mrf.mxu1 }
 0x1e3   : > { %v823_v24 = vpop.f32.mrf.mxu0 }
 0x1e4   : > { %v2550_v25 = vpop.f32.mrf.mxu1  ;;  %v824_v7 = vadd.f32 %v823_v24, %v719_v23 }
 0x1e5   : > { %v2578_v26 = vpop.f32.mrf.mxu0 }
 0x1e6   : > { %v724_v27 = vpop.f32.mrf.mxu1 }
 0x1e7   : > { %v828_v28 = vpop.f32.mrf.mxu0 }
 0x1e8   : > { %v2553_v29 = vpop.f32.mrf.mxu1  ;;  %v829_v15 = vadd.f32 %v828_v28, %v724_v27 }
 0x1e9   : > { %v2581_v30 = vpop.f32.mrf.mxu0 }
 0x1ea   : > { %v727_v31 = vpop.f32.mrf.mxu1 }
 0x1eb   : > { %v831_v32 = vpop.f32.mrf.mxu0 }
 0x1ec   : > { %v2554_v33 = vpop.f32.mrf.mxu1 }
 0x1ed   : > { %v2582_v34 = vpop.f32.mrf.mxu0 }
 0x1f6   : > { %v941_v35 = vpop.f32.mrf.mxu1 }
 0x1f7   : > { %v1075_v36 = vpop.f32.mrf.mxu0  ;;  %v963_v60 = vadd.f32 %v941_v35, %v813_v59  ;;  %v2944_v59 = vld [vmem:[#allocation7 + $0xa0] sm:$0xff]  }
 0x1f8   : > { %v2601_v37 = vpop.f32.mrf.mxu1 }
 0x1f9   : > { %v2629_v38 = vpop.f32.mrf.mxu0  ;;  %v1097_v62 = vadd.f32 %v1075_v36, %v963_v60  ;;  %v2945_v60 = vld [vmem:[#allocation7 + $0xe0] sm:$0xff]  }
 0x1fa   : > { %v944_v39 = vpop.f32.mrf.mxu1 }
 0x1fb   : > { %v1078_v40 = vpop.f32.mrf.mxu0  ;;  %v964_v0 = vadd.f32 %v944_v39, %v816_v61  ;;  %v2946_v61 = vld [vmem:[#allocation7 + $0x98] sm:$0xff]  }
 0x1fc   : > { %v2602_v41 = vpop.f32.mrf.mxu1 }
 0x1fd   : > { %v2630_v42 = vpop.f32.mrf.mxu0  ;;  %v1098_v4 = vadd.f32 %v1078_v40, %v964_v0  ;;  %v2950_v0 = vld [vmem:[#allocation7 + $0x88] sm:$0xff]  }
 0x1fe   : > { %v949_v43 = vpop.f32.mrf.mxu1 }
 0x1ff   : > { %v1083_v44 = vpop.f32.mrf.mxu0 }
 0x200   : > { %v2605_v45 = vpop.f32.mrf.mxu1 }
 0x201   : > { %v2633_v46 = vpop.f32.mrf.mxu0 }
 0x202   : > { %v952_v47 = vpop.f32.mrf.mxu1 }
 0x203   : > { %v1086_v48 = vpop.f32.mrf.mxu0  ;;  %v966_v17 = vadd.f32 %v952_v47, %v824_v7 }
 0x204   : > { %v2606_v49 = vpop.f32.mrf.mxu1 }
 0x205   : > { %v2634_v50 = vpop.f32.mrf.mxu0  ;;  %v1100_v19 = vadd.f32 %v1086_v48, %v966_v17  ;;  %v2956_v17 = vld [vmem:[#allocation7 + $0x128] sm:$0xff]  }
 0x206   : > { %v957_v51 = vpop.f32.mrf.mxu1 }
 0x207   : > { %v1091_v52 = vpop.f32.mrf.mxu0  ;;  %v967_v20 = vadd.f32 %v957_v51, %v829_v15  ;;  %v2959_v15 = vld [vmem:[#allocation7 + $0x110] sm:$0xff]  }
 0x208   : > { %v2609_v53 = vpop.f32.mrf.mxu1 }
 0x209   : > { %v2637_v54 = vpop.f32.mrf.mxu0  ;;  %v1101_v26 = vadd.f32 %v1091_v52, %v967_v20  ;;  %v2940_v53 = vld [vmem:[#allocation7 + $0xb0] sm:$0xff]  }
 0x20a   : > { %v960_v55 = vpop.f32.mrf.mxu1  ;;  %v2941_v54 = vld [vmem:[#allocation7 + $0xf0] sm:$0xff]  }
 0x20b   : > { %v1094_v56 = vpop.f32.mrf.mxu0  ;;  %v3436_v55 = vld [vmem:[#allocation3] sm:$0xff] }
 0x20c   : > { %v2610_v57 = vpop.f32.mrf.mxu1 }
 0x20d   : > { %v2638_v58 = vpop.f32.mrf.mxu0  ;;  %v2942_v57 = vld [vmem:[#allocation7 + $0xa8] sm:$0xff]  }
 0x20e   : > { %v2943_v58 = vld [vmem:[#allocation7 + $0xe8] sm:$0xff]  }
 0x216   : > { %v1209_v63 = vpop.f32.mrf.mxu1 }
 0x217   : > { %v1231_v2 = vadd.f32 %v1209_v63, %v1097_v62  ;;  %v2949_v62 = vld [vmem:[#allocation7 + $0xd0] sm:$0xff]   ;;  %v2951_v63 = vld [vmem:[#allocation7 + $0xc8] sm:$0xff]  }
 0x218   : > { %v2657_v3 = vpop.f32.mrf.mxu1 }
 0x219   : > { %v1243_v5 = vadd.f32 %v2329_v1, %v1231_v2  ;;  %v2953_v2 = vld [vmem:[#allocation7 + $0xc0] sm:$0xff]   ;;  %v2954_v3 = vld [vmem:[#allocation7 + $0x138] sm:$0xff]  }
 0x21a   : > { %v1212_v6 = vpop.f32.mrf.mxu1 }
 0x21b   : > { %v1248_v8 = vmax.f32 %v1243_v5, 0.0  ;;  %v1232_v13 = vadd.f32 %v1212_v6, %v1098_v4 }
 0x21c   : > { %v2658_v14 = vpop.f32.mrf.mxu1 }
 0x21d   : > { %1253 = vst [vmem:[#allocation4] sm:$0xff] %v1248_v8  ;;  %v1244_v11 = vadd.f32 %v2329_v1, %v1232_v13  ;;  %v2955_v13 = vld [vmem:[#allocation7 + $0x130] sm:$0xff]  }
 0x21e   : > { %v1217_v12 = vpop.f32.mrf.mxu1 }
 0x21f   : > { %v1249_v16 = vmax.f32 %v1244_v11, 0.0  ;;  %v2957_v11 = vld [vmem:[#allocation7 + $0x120] sm:$0xff]   ;;  %v2958_v12 = vld [vmem:[#allocation7 + $0x118] sm:$0xff]  }
 0x220   : > { %v2661_v18 = vpop.f32.mrf.mxu1 }
 0x221   : > { %1254 = vst [vmem:[#allocation4 + $0x8] sm:$0xff] %v1249_v16  ;;  %v2960_v16 = vld [vmem:[#allocation7 + $0x108] sm:$0xff]   ;;  %v2961_v18 = vld [vmem:[#allocation7 + $0x100] sm:$0xff]  }
 0x222   : > { %v1220_v21 = vpop.f32.mrf.mxu1 }
 0x223   : > { %v1234_v22 = vadd.f32 %v1220_v21, %v1100_v19  ;;  %v1938_v21 = vld [vmem:[%s3598_s7 + $0x78] sm:$0xff] }
 0x224   : > { %v2662_v25 = vpop.f32.mrf.mxu1 }
 0x225   : > { %v1246_v29 = vadd.f32 %v2329_v1, %v1234_v22  ;;  %v1937_v22 = vld [vmem:[%s3598_s7 + $0x70] sm:$0xff]  ;;  %v1936_v25 = vld [vmem:[%s3598_s7 + $0x68] sm:$0xff] }
 0x226   : > { %v1225_v30 = vpop.f32.mrf.mxu1 }
 0x227   : > { %v1251_v23 = vmax.f32 %v1246_v29, 0.0  ;;  %v1235_v24 = vadd.f32 %v1225_v30, %v1101_v26  ;;  %v1935_v26 = vld [vmem:[%s3598_s7 + $0x60] sm:$0xff]  ;;  %v1934_v29 = vld [vmem:[%s3598_s7 + $0x58] sm:$0xff]  ;;  %v1933_v30 = vld [vmem:[%s3598_s7 + $0x50] sm:$0xff] }
 0x228   : > { %v1258_v31 = vld [vmem:[#allocation4] ss:$2 sm:$0xff]  ;;  %v1260_v32 = vld [vmem:[#allocation4 + $0x1] ss:$2 sm:$0xff]  ;;  %v2665_v33 = vpop.f32.mrf.mxu1 }
 0x229   : > { %v1261_v34 = vmax.f32 %v1258_v31, %v1260_v32  ;;  %1256 = vst [vmem:[#allocation4 + $0x18] sm:$0xff] %v1251_v23  ;;  %v1247_v35 = vadd.f32 %v2329_v1, %v1235_v24  ;;  %v2952_v1 = vld [vmem:[#allocation7 + $0x80] sm:$0xff]   ;;  %v1932_v23 = vld [vmem:[%s3598_s7 + $0x48] sm:$0xff]  ;;  %v1930_v31 = vld [vmem:[%s3598_s7 + $0x38] sm:$0xff] }
 0x22a   : > { %v1228_v27 = vpop.f32.mrf.mxu1  ;;  %v1931_v24 = vld [vmem:[%s3598_s7 + $0x40] sm:$0xff]  ;;  %v1929_v32 = vld [vmem:[%s3598_s7 + $0x30] sm:$0xff]  ;;  %v1928_v33 = vld [vmem:[%s3598_s7 + $0x28] sm:$0xff] }
 0x22b   : > { %1262 = vst [vmem:[#allocation5 + $0x8] sm:$0xff] %v1261_v34  ;;  %v1252_v28 = vmax.f32 %v1247_v35, 0.0  ;;  %v1507_v56 = vpack.c.bf16 %v3436_v55, %v1261_v34  ;;  %v1927_v34 = vld [vmem:[%s3598_s7 + $0x20] sm:$0xff]  ;;  %v1926_v35 = vld [vmem:[%s3598_s7 + $0x18] sm:$0xff]  ;;  %v1925_v27 = vld [vmem:[%s3598_s7 + $0x10] sm:$0xff] }
 0x22c   : > { %v2666_v36 = vpop.f32.mrf.mxu1 }
 0x22d   : > { %1257 = vst [vmem:[#allocation4 + $0x20] sm:$0xff] %v1252_v28  ;;  %v1924_v28 = vld [vmem:[%s3598_s7 + $0x8] sm:$0xff]  ;;  %v1923_v36 = vld [vmem:[%s3598_s7] sm:$0xff] }
 0x232   : > { %v1290_v37 = vld [vmem:[#allocation5 + $0x7] sm:$0xff]  ;;  %v1291_v38 = vld [vmem:[#allocation5 + $0xf] sm:$0xff] }
 0x233   : > { %v1269_v39 = vld [vmem:[#allocation5 + $0x6] sm:$0xff]  ;;  %v1293_v40 = vpack.c.bf16 %v1291_v38, %v1290_v37  ;;  %v1270_v41 = vld [vmem:[#allocation5 + $0xe] sm:$0xff]  ;;  %v2024_v37 = vld [vmem:[%s3600_s9 + $0x38] sm:$0xff] }
 0x234   : > { %v1264_v42 = vld [vmem:[#allocation4 + $0x18] ss:$2 sm:$0xff]  ;;  %v1266_v43 = vld [vmem:[#allocation4 + $0x19] ss:$2 sm:$0xff]  ;;  %v1272_v44 = vpack.c.bf16 %v1270_v41, %v1269_v39  ;;  %v2022_v39 = vld [vmem:[%s3600_s9 + $0x28] sm:$0xff] }
 0x235   : > { %v3433_v45 = vmax.f32 %v1264_v42, %v1266_v43  ;;  %2683 = vmatprep.mubr.bf16.mxu0 %v1293_v40  ;;  %v1625_v46 = vld [vmem:[#allocation5 + $0x9] sm:$0xff]  ;;  %v2021_v40 = vld [vmem:[%s3600_s9 + $0x20] sm:$0xff]  ;;  %v2020_v41 = vld [vmem:[%s3600_s9 + $0x18] sm:$0xff] }
 0x236   : > { %2703 = vmatprep.mubr.bf16.mxu1 %v1272_v44  ;;  %v1746_v8 = vld [vmem:[#allocation5 + $0xa] sm:$0xff] }
 0x237   : > { %1268 = vst [vmem:[#allocation5 + $0x18] sm:$0xff] %v3433_v45  ;;  %v1508_v6 = vpack.c.bf16 %v3433_v45, %v3433_v45  ;;  %v2023_v38 = vld [vmem:[%s3600_s9 + $0x30] sm:$0xff] }
 0x23e   : > { %v1292_v47 = vld [vmem:[#allocation5 + $0x17] sm:$0xff] }
 0x23f   : > { %v1271_v48 = vld [vmem:[#allocation5 + $0x16] sm:$0xff]  ;;  %v1294_v50 = vpack.c.bf16 %v1292_v47, %v1292_v47 }
 0x240   : > { %v1626_v49 = vld [vmem:[#allocation5 + $0x11] sm:$0xff]  ;;  %v1273_v51 = vpack.c.bf16 %v1271_v48, %v1271_v48  ;;  %v1627_v4 = vld [vmem:[#allocation5 + $0x19] sm:$0xff] }
 0x241   : > { %v1628_v52 = vpack.c.bf16 %v1626_v49, %v1625_v46  ;;  %2684 = vmatmul.mubr.bf16.vlgmr.msra.gmra.mxu0 %v1294_v50  ;;  %v1747_v5 = vld [vmem:[#allocation5 + $0x12] sm:$0xff]  ;;  %v1629_v7 = vpack.c.bf16 %v1627_v4, %v1627_v4  ;;  %v1748_v19 = vld [vmem:[#allocation5 + $0x1a] sm:$0xff] }
 0x242   : > { %2704 = vmatmul.mubr.bf16.vlgmr.msra.gmra.mxu1 %v1273_v51  ;;  %2708 = vmatpush3.bf16.msra.mxu0 %v3424_v9  ;;  %v2947_v9 = vld [vmem:[#allocation7 + $0xd8] sm:$0xff]   ;;  %v1749_v14 = vpack.c.bf16 %v1747_v5, %v1746_v8  ;;  %v1750_v20 = vpack.c.bf16 %v1748_v19, %v1748_v19 }
 0x243   : > { %2728 = vmatpush3.bf16.msra.mxu1 %v3426_v10  ;;  %2723 = vmatprep.mubr.bf16.mxu0 %v1507_v56  ;;  %v2948_v10 = vld [vmem:[#allocation7 + $0x90] sm:$0xff]  }
 0x244   : > { %2743 = vmatprep.mubr.bf16.mxu1 %v1628_v52  ;;  %2709 = vmatprep.subr.bf16.mxu0 %v2940_v53 }
 0x245   : > { %2729 = vmatprep.subr.bf16.mxu1 %v2941_v54 }
 0x246   : > { %2710 = vmatpush3.bf16.msra.mxu0 %v2940_v53 }
 0x247   : > { %2730 = vmatpush3.bf16.msra.mxu1 %v2941_v54  ;;  %2711 = vmatprep.subr.bf16.mxu0 %v2942_v57 }
 0x248   : > { %2731 = vmatprep.subr.bf16.mxu1 %v2943_v58 }
 0x24a   : > { %2712 = vmatpush3.bf16.msra.mxu0 %v2942_v57 }
 0x24b   : > { %2732 = vmatpush3.bf16.msra.mxu1 %v2943_v58  ;;  %2713 = vmatprep.subr.bf16.mxu0 %v2944_v59 }
 0x24c   : > { %2733 = vmatprep.subr.bf16.mxu1 %v2945_v60 }
 0x24e   : > { %2714 = vmatpush3.bf16.msra.mxu0 %v2944_v59 }
 0x24f   : > { %2734 = vmatpush3.bf16.msra.mxu1 %v2945_v60  ;;  %2715 = vmatprep.subr.bf16.mxu0 %v2946_v61 }
 0x250   : > { %2735 = vmatprep.subr.bf16.mxu1 %v2947_v9 }
 0x252   : > { %2716 = vmatpush3.bf16.msra.mxu0 %v2946_v61 }
 0x253   : > { %2736 = vmatpush3.bf16.msra.mxu1 %v2947_v9  ;;  %2717 = vmatprep.subr.bf16.mxu0 %v2948_v10 }
 0x254   : > { %2737 = vmatprep.subr.bf16.mxu1 %v2949_v62 }
 0x256   : > { %2718 = vmatpush3.bf16.msra.mxu0 %v2948_v10 }
 0x257   : > { %2738 = vmatpush3.bf16.msra.mxu1 %v2949_v62  ;;  %2719 = vmatprep.subr.bf16.mxu0 %v2950_v0  ;;  %v2370_v62 = vld [vmem:[%s3597_s6] ss:$0 sm:$0xff] }
 0x258   : > { %2739 = vmatprep.subr.bf16.mxu1 %v2951_v63 }
 0x25a   : > { %2720 = vmatpush3.bf16.msra.mxu0 %v2950_v0 }
 0x25b   : > { %2740 = vmatpush3.bf16.msra.mxu1 %v2951_v63  ;;  %2721 = vmatprep.subr.bf16.mxu0 %v2952_v1 }
 0x25c   : > { %2741 = vmatprep.subr.bf16.mxu1 %v2953_v2 }
 0x25e   : > { %2722 = vmatpush3.bf16.msra.mxu0 %v2952_v1 }
 0x25f   : > { %2742 = vmatpush3.bf16.msra.mxu1 %v2953_v2  ;;  %2747 = vmatprep.subr.bf16.mxu0 %v2954_v3 }
 0x260   : > { %2767 = vmatprep.subr.mxu1 %v3436_v55 }
 0x261   : > { %2724 = vmatmul.mubr.bf16.vlgmr.msra.gmra.mxu0 %v1508_v6 }
 0x262   : > { %2744 = vmatmul.mubr.bf16.vlgmr.msra.gmra.mxu1 %v1629_v7  ;;  %2748 = vmatpush3.bf16.msra.mxu0 %v2954_v3 }
 0x263   : > { %2763 = vmatprep.mubr.bf16.mxu0 %v1749_v14  ;;  %2749 = vmatprep.subr.bf16.mxu0 %v2955_v13 }
 0x264   : > { %2799 = vmatprep.mubr.msk.f32.mxu1 %vm3063_vm2, %v3436_v55  ;;  %2768 = vmatpush3.msra.mxu1 %v1938_v21 }
 0x265   : > { %2769 = vmatprep.subr.mxu1 %v3436_v55 }
 0x266   : > { %2750 = vmatpush3.bf16.msra.mxu0 %v2955_v13  ;;  %2770 = vmatpush3.msra.mxu1 %v1937_v22 }
 0x267   : > { %2751 = vmatprep.subr.bf16.mxu0 %v2956_v17  ;;  %2771 = vmatprep.subr.mxu1 %v3436_v55 }
 0x268   : > { %2772 = vmatpush3.msra.mxu1 %v1936_v25 }
 0x269   : > { %2773 = vmatprep.subr.mxu1 %v3436_v55 }
 0x26a   : > { %2752 = vmatpush3.bf16.msra.mxu0 %v2956_v17  ;;  %2774 = vmatpush3.msra.mxu1 %v1935_v26 }
 0x26b   : > { %2753 = vmatprep.subr.bf16.mxu0 %v2957_v11  ;;  %2775 = vmatprep.subr.mxu1 %v3436_v55 }
 0x26c   : > { %2776 = vmatpush3.msra.mxu1 %v1934_v29 }
 0x26d   : > { %2777 = vmatprep.subr.mxu1 %v3436_v55 }
 0x26e   : > { %2754 = vmatpush3.bf16.msra.mxu0 %v2957_v11  ;;  %2778 = vmatpush3.msra.mxu1 %v1933_v30 }
 0x26f   : > { %2755 = vmatprep.subr.bf16.mxu0 %v2958_v12  ;;  %2779 = vmatprep.subr.mxu1 %v3436_v55 }
 0x270   : > { %2780 = vmatpush3.msra.mxu1 %v1932_v23 }
 0x271   : > { %2781 = vmatprep.subr.mxu1 %v3436_v55 }
 0x272   : > { %2756 = vmatpush3.bf16.msra.mxu0 %v2958_v12  ;;  %2782 = vmatpush3.msra.mxu1 %v1931_v24 }
 0x273   : > { %2757 = vmatprep.subr.bf16.mxu0 %v2959_v15  ;;  %2783 = vmatprep.subr.mxu1 %v3436_v55 }
 0x274   : > { %2784 = vmatpush3.msra.mxu1 %v1930_v31 }
 0x275   : > { %2785 = vmatprep.subr.mxu1 %v3436_v55 }
 0x276   : > { %2758 = vmatpush3.bf16.msra.mxu0 %v2959_v15  ;;  %2786 = vmatpush3.msra.mxu1 %v1929_v32 }
 0x277   : > { %2759 = vmatprep.subr.bf16.mxu0 %v2960_v16  ;;  %2787 = vmatprep.subr.mxu1 %v3436_v55 }
 0x278   : > { %2788 = vmatpush3.msra.mxu1 %v1928_v33 }
 0x279   : > { %2789 = vmatprep.subr.mxu1 %v3436_v55 }
 0x27a   : > { %2760 = vmatpush3.bf16.msra.mxu0 %v2960_v16  ;;  %2790 = vmatpush3.msra.mxu1 %v1927_v34 }
 0x27b   : > { %2761 = vmatprep.subr.bf16.mxu0 %v2961_v18  ;;  %2791 = vmatprep.subr.mxu1 %v3436_v55 }
 0x27c   : > { %2792 = vmatpush3.msra.mxu1 %v1926_v35 }
 0x27d   : > { %2793 = vmatprep.subr.mxu1 %v3436_v55 }
 0x27e   : > { %2762 = vmatpush3.bf16.msra.mxu0 %v2961_v18  ;;  %2794 = vmatpush3.msra.mxu1 %v1925_v27 }
 0x27f   : > { %2802 = vmatprep.subr.mxu0 %v3436_v55  ;;  %2795 = vmatprep.subr.mxu1 %v3436_v55 }
 0x280   : > { %2796 = vmatpush3.msra.mxu1 %v1924_v28 }
 0x281   : > { %2764 = vmatmul.mubr.bf16.vlgmr.msra.gmra.mxu0 %v1750_v20  ;;  %2797 = vmatprep.subr.mxu1 %v3436_v55 }
 0x282   : > { %2818 = vmatprep.mubr.msk.f32.mxu0 %vm3063_vm2, %v3436_v55  ;;  %2798 = vmatpush3.msra.mxu1 %v1923_v36 }
 0x283   : > { %2803 = vmatpush3.msra.mxu0 %v2024_v37 }
 0x284   : > { %2804 = vmatprep.subr.mxu0 %v3436_v55 }
 0x285   : > { %2805 = vmatpush3.msra.mxu0 %v2023_v38 }
 0x286   : > { %2806 = vmatprep.subr.mxu0 %v3436_v55 }
 0x287   : > { %2807 = vmatpush3.msra.mxu0 %v2022_v39 }
 0x288   : > { %2808 = vmatprep.subr.mxu0 %v3436_v55 }
 0x289   : > { %2809 = vmatpush3.msra.mxu0 %v2021_v40 }
 0x28a   : > { %2810 = vmatprep.subr.mxu0 %v3436_v55 }
 0x28b   : > { %2811 = vmatpush3.msra.mxu0 %v2020_v41 }
 0x28c   : > { %2812 = vmatprep.subr.mxu0 %v3436_v55 }
 0x301   : > { %v2685_v42 = vpop.f32.mrf.mxu0 }
 0x302   : > { %v2705_v43 = vpop.f32.mrf.mxu1 }
 0x303   : > { %v1394_v44 = vpop.f32.mrf.mxu0  ;;  %v1499_v57 = vadd.f32 %v2705_v43, %v2685_v42  ;;  %v2019_v43 = vld [vmem:[%s3600_s9 + $0x10] sm:$0xff] }
 0x304   : > { %v1490_v45 = vpop.f32.mrf.mxu1  ;;  %2813 = vmatpush3.msra.mxu0 %v2019_v43 }
 0x305   : > { %v2686_v46 = vpop.f32.mrf.mxu0  ;;  %v1491_v58 = vadd.f32 %v1490_v45, %v1394_v44  ;;  %2814 = vmatprep.subr.mxu0 %v3436_v55  ;;  %v2018_v44 = vld [vmem:[%s3600_s9 + $0x8] sm:$0xff]  ;;  %v2017_v45 = vld [vmem:[%s3600_s9] sm:$0xff] }
 0x306   : > { %v2706_v47 = vpop.f32.mrf.mxu1  ;;  %2815 = vmatpush3.msra.mxu0 %v2018_v44  ;;  %v2371_v46 = vld [vmem:[%s3599_s8] ss:$0 sm:$0xff] }
 0x307   : > { %v1397_v48 = vpop.f32.mrf.mxu0  ;;  %2816 = vmatprep.subr.mxu0 %v3436_v55 }
 0x308   : > { %v1493_v49 = vpop.f32.mrf.mxu1  ;;  %2817 = vmatpush3.msra.mxu0 %v2017_v45 }
 0x321   : > { %v2725_v50 = vpop.f32.mrf.mxu0 }
 0x322   : > { %v2745_v51 = vpop.f32.mrf.mxu1  ;;  %v1624_v59 = vadd.f32 %v2725_v50, %v1499_v57 }
 0x323   : > { %v1608_v52 = vpop.f32.mrf.mxu0 }
 0x324   : > { %v1729_v53 = vpop.f32.mrf.mxu1  ;;  %v1622_v60 = vadd.f32 %v1608_v52, %v1491_v58  ;;  %v1745_v9 = vadd.f32 %v2745_v51, %v1624_v59  ;;  %v2372_v51 = vld [vmem:[%s3601_s10] ss:$0 sm:$0xff] }
 0x325   : > { %v2726_v54 = vpop.f32.mrf.mxu0 }
 0x326   : > { %v2746_v56 = vpop.f32.mrf.mxu1  ;;  %v1743_v0 = vadd.f32 %v1729_v53, %v1622_v60 }
 0x327   : > { %v1611_v61 = vpop.f32.mrf.mxu0 }
 0x328   : > { %v1732_v4 = vpop.f32.mrf.mxu1 }
 0x341   : > { %v2765_v10 = vpop.f32.mrf.mxu0 }
 0x342   : > { %v1866_v63 = vadd.f32 %v2765_v10, %v1745_v9 }
 0x343   : > { %v1850_v1 = vpop.f32.mrf.mxu0 }
 0x344   : > { %v1876_v2 = vadd.f32 %v2370_v62, %v1866_v63  ;;  %v1864_v3 = vadd.f32 %v1850_v1, %v1743_v0 }
 0x345   : > { %v2766_v5 = vpop.f32.mrf.mxu0 }
 0x346   : > { %v1879_v6 = vmax.f32 %v1876_v2, 0.0  ;;  %v1874_v7 = vadd.f32 %v2370_v62, %v1864_v3 }
 0x347   : > { %v1853_v8 = vpop.f32.mrf.mxu0 }
 0x348   : > { %1882 = vst [vmem:[#allocation6 + $0x10] sm:$0xff] %v1879_v6  ;;  %v1877_v13 = vmax.f32 %v1874_v7, 0.0 }
 0x34a   : > { %1880 = vst [vmem:[#allocation6] sm:$0xff] %v1877_v13 }
 0x34f   : > { %v1903_v14 = vld [vmem:[#allocation6 + $0x10] ss:$4 sm:$0x3]  ;;  %v1905_v17 = vld [vmem:[#allocation6 + $0x11] ss:$4 sm:$0x3] }
 0x350   : > { %v1906_v11 = vmax.f32 %v1903_v14, %v1905_v17  ;;  %v1908_v12 = vld [vmem:[#allocation6 + $0x12] ss:$4 sm:$0x3]  ;;  %v1911_v21 = vld [vmem:[#allocation6 + $0x13] ss:$4 sm:$0x3] }
 0x351   : > { %v1883_v15 = vld [vmem:[#allocation6] ss:$4 sm:$0x3]  ;;  %v1885_v16 = vld [vmem:[#allocation6 + $0x1] ss:$4 sm:$0x3] }
 0x352   : > { %v1886_v18 = vmax.f32 %v1883_v15, %v1885_v16  ;;  %v1909_v19 = vmax.f32 %v1906_v11, %v1908_v12  ;;  %v1888_v20 = vld [vmem:[#allocation6 + $0x2] ss:$4 sm:$0x3]  ;;  %v1891_v26 = vld [vmem:[#allocation6 + $0x3] ss:$4 sm:$0x3] }
 0x354   : > { %v1889_v22 = vmax.f32 %v1886_v18, %v1888_v20  ;;  %v1912_v25 = vmax.f32 %v1909_v19, %v1911_v21 }
 0x356   : > { %v1892_v29 = vmax.f32 %v1889_v22, %v1891_v26  ;;  %v1913_v30 = vsel %vm469_vm0, %v1912_v25, 0.0 }
 0x357   : > { %v1914_v23 = vrot.slane %v1913_v30, 4 }
 0x358   : > { %v1893_v24 = vsel %vm469_vm0, %v1892_v29, 0.0 }
 0x359   : > { %v1894_v31 = vrot.slane %v1893_v24, 4  ;;  %v1915_v32 = vadd.f32 %v1914_v23, %v1913_v30 }
 0x35b   : > { %v1895_v33 = vadd.f32 %v1894_v31, %v1893_v24  ;;  %v1916_v34 = vrot.slane %v1915_v32, 2 }
 0x35d   : > { %v1896_v35 = vrot.slane %v1895_v33, 2  ;;  %v1917_v27 = vadd.f32 %v1916_v34, %v1915_v32 }
 0x35f   : > { %v1897_v28 = vadd.f32 %v1896_v35, %v1895_v33  ;;  %v1918_v36 = vrot.slane %v1917_v27, 1 }
 0x361   : > { %v1898_v37 = vrot.slane %v1897_v28, 1  ;;  %v1919_v38 = vadd.f32 %v1918_v36, %v1917_v27 }
 0x363   : > { %v1899_v39 = vadd.f32 %v1898_v37, %v1897_v28  ;;  %v1920_v41 = vmul.f32 0.5, %v1919_v38 }
 0x365   : > { %v1901_v40 = vmul.f32 0.5, %v1899_v39 }
 0x367   : > { %v1922_v42 = vsel %vm1921_vm3, %v1901_v40, %v1920_v41 }
 0x368   : > { %2800 = vmatmul.mubr.f32.vlgmr.msra.gmra.mxu1 %v1922_v42 }
 0x428   : > { %v2012_v47 = vpop.f32.mrf.mxu1 }
 0x429   : > { %v2013_v48 = vadd.f32 %v2371_v46, %v2012_v47 }
 0x42a   : > { %v2801_v49 = vpop.f32.mrf.mxu1 }
 0x42b   : > { %v2016_v50 = vmax.f32 %v2013_v48, 0.0 }
 0x42d   : > { %2819 = vmatmul.mubr.msk.f32.vlgmr.msra.gmra.mxu0 %vm2032_vm4, %v2016_v50 }
 0x4ed   : > { %v2102_v52 = vpop.f32.mrf.mxu0 }
 0x4ee   : > { %v2103_v53 = vadd.f32 %v2372_v51, %v2102_v52 }
 0x4ef   : > { %v2820_v55 = vpop.f32.mrf.mxu0 }
 0x4f0   : > { %v2107_v54 = vsel %vm2106_vm5, %v2103_v53, -inf }
 0x4f1   : > { %2108 = vmax.xlane.f32.xlu0 %v2107_v54 }
 0x57a   : > { %v2109_v56 = vpop.xlane.xlu0 %2108 }
 0x57b   : > { %v2110_v57 = vsub.f32 %v2103_v53, %v2109_v56 }
 0x57d   : > { %v2111_v58 = vmul.f32 1.442695, %v2110_v57 }
 0x57f   : > { %2962 = vpow2.f32 %v2111_v58 }
 0x58c   : > { %v2963_v59 = vpop.eup %2962 }
 0x58d   : > { %v2113_v60 = vsel %vm2106_vm5, %v2963_v59, 0.0 }
 0x58e   : > { %2114 = vadd.xlane.f32.xlu0 %v2113_v60 }
 0x617   : > { %v2115_v61 = vpop.xlane.xlu0 %2114 }
 0x618   : > { %2964 = vlog2.f32 %v2115_v61 }
 0x625   : > { %v2965_v9 = vpop.eup %2964 }
 0x626   : > { %v2117_v10 = vmul.f32 0.6931472, %v2965_v9 }
 0x628   : > { %v2118_v62 = vsub.f32 %v2110_v57, %v2117_v10 }
 0x62a   : > { %2119 = vst.msk [vmem:[%s395_s24] sm:$0x3] %vm2106_vm5, %v2118_v62 }
 0x62b   : > { %3006 = shalt.err (!%p3003_p0)
}
 0x62c   : > { %s3007_s12 = scalar_lea.hbm %s2132_s13, 32  ;;  %s3011_s24 = scalar_lea.hbm %s3602_s11, 64 }
 0x62d   : > { %p3008_p1 = scmp.ne.s32.totalorder %s2132_s13, %s3007_s12  ;;  %p3012_p4 = scmp.lt.s32.totalorder %s2132_s13, %s3602_s11 }
 0x62e   : > { %p3013_p7 = scmp.lt.s32.totalorder %s3011_s24, %s3007_s12 }
 0x62f   : > { %p3009_p2 = pnand %p3008_p1, %p3163_p5 }
 0x630   : > { %p3014_p8 = por %p3013_p7, %p3012_p4 }
 0x631   : > { %p3010_p3 = pneg %p3009_p2 }
 0x633   : > { %p3015_p6 = pnand %p3014_p8, %p3010_p3 }
 0x635   : > { %3018 = shalt.err (!%p3015_p6)
}
 0x636   : > { %2826 = dma.vmem_to_hbm [thread:$0]  (%p3163_p5), %s2135_s25, 32, %s2132_s13, %s2121_s14  }
 0x637 PF: > { %p2838_p9 = scmp.ge.s32.totalorder %s3057_s20, 2  ;;  %s2146_s0 = sand.u32 1, %s3045_s17  }
 0x638   : > { %p3610_p10 = scmp.ne.s32.totalorder %s3606_s28, 0  ;;  %s2147_s1 = scalar_lea.sflag [#allocation9], %s2146_s0 }
 0x63a   : > { %p2833_p11 = pnand %p2838_p9, %p3610_p10 }
 0x63c   : > { %p2834_p12 = pneg %p2833_p11 }
 0x63e   : > { %3040 = dma.done.wait (%p2834_p12), %s2147_s1, 32  }
 0x63f   : > { %3042 = vsyncadd (%p2834_p12), %s2147_s1, 4294967264  ;;  %p22_p13 = scmp.ge.s32.totalorder %s3150_s23, 4   ;;  %s3611_s17 = smov %s3049_s18 }
 0x640   : > { %s3612_s18 = smov %s3053_s19  ;;  %s3613_s19 = smov %s3161_s26 }
 0x641   : > { %s3614_s20 = smov %s3150_s23  ;;  %24 = sbr.rel (!%p22_p13) target bundleno = 7 (0x7), region = 129 }
 0x646   :  { %2152 = vsyncpa [#allocation8], 1 }
 0x647   :  { %2154 = vsyncpa [#allocation8 + $0x1], 1 }
 0x648   :  { %2155 = vsyncpa [#allocation9], 1 }
 0x649   :  { %2157 = vsyncpa [#allocation9 + $0x1], 1 }

</bundles_post_ra>
